<compile_context>
chip_gen: v7x
topology: tpu7x:2x2x1
jax: 0.10.0
libtpu: 0.0.40
codegen_flags: <defaults>
</compile_context>

<pallas_src>
import math

import jax
import jax.numpy as jnp
from jax.experimental import pallas as pl
from jax.experimental.pallas import tpu as pltpu

# ----------------------------- small config -----------------------------
HIDDEN = 32          # config.hidden_size
HEADS = 2
HEAD_DIM = HIDDEN // HEADS
LAYERS = 2
INTERMEDIATE = 4 * HIDDEN
VOCAB = 100
MAX_POS = 16
TYPE_VOCAB = 2
N_CLASSES = 3        # config.n_classes
N_PAD = 128          # lane-dense padded classifier width
LN_EPS = 1e-12

BATCH = 2
SEQ = 8


# ----------------------------- fused Pallas kernel -----------------------------
def _bert_kernel(word_ref, pos_ref, type_ref, mask_ref,
                 emb_g_ref, emb_b_ref,
                 qkv_w_ref, qkv_b_ref, o_w_ref, o_b_ref,
                 ln1_g_ref, ln1_b_ref,
                 i_w_ref, i_b_ref, f_w_ref, f_b_ref,
                 ln2_g_ref, ln2_b_ref,
                 pool_w_ref, pool_b_ref, cls_w_ref, cls_b_ref,
                 out_ref):
    """One batch element: embeddings -> LAYERS encoder blocks -> pooler -> classifier."""

    def layer_norm(x, g, b):
        mean = jnp.mean(x, axis=-1, keepdims=True)
        var = jnp.mean((x - mean) ** 2, axis=-1, keepdims=True)
        return (x - mean) * jax.lax.rsqrt(var + LN_EPS) * g + b

    # --- embeddings: sum + LayerNorm (all in VMEM) ---
    h = word_ref[0] + pos_ref[...] + type_ref[0]            # (S, H)
    h = layer_norm(h, emb_g_ref[...], emb_b_ref[...])
    # TODO(synk): hidden_dropout / attention_probs_dropout are identity in eval mode.

    add_mask = mask_ref[0]                                   # (1, S), additive -1e9 padding
    scale = 1.0 / math.sqrt(HEAD_DIM)

    for l in range(LAYERS):
        # --- fused QKV projection: one (S,H) @ (H,3H) matmul ---
        qkv = jnp.dot(h, qkv_w_ref[l], preferred_element_type=jnp.float32) + qkv_b_ref[l]  # (S, 3H)

        o_w_l = o_w_ref[l]                                   # (H, H)
        attn_out = o_b_ref[l]                                # (1, H) -> broadcasts to (S, H)
        for hd in range(HEADS):
            lo = hd * HEAD_DIM
            q = qkv[:, lo:lo + HEAD_DIM]                                    # (S, Dh)
            k = qkv[:, HIDDEN + lo:HIDDEN + lo + HEAD_DIM]                  # (S, Dh)
            v = qkv[:, 2 * HIDDEN + lo:2 * HIDDEN + lo + HEAD_DIM]          # (S, Dh)

            # scores = q @ k^T without an explicit transpose (contract last axes)
            scores = jax.lax.dot_general(
                q, k, (((1,), (1,)), ((), ())),
                preferred_element_type=jnp.float32) * scale                 # (S, S)
            scores = scores + add_mask                                      # broadcast over rows

            mx = jnp.max(scores, axis=-1, keepdims=True)
            p = jnp.exp(scores - mx)
            p = p / jnp.sum(p, axis=-1, keepdims=True)

            ctx_h = jnp.dot(p, v, preferred_element_type=jnp.float32)       # (S, Dh)
            # head-merge + output projection fused: ctx @ o_w == sum_h ctx_h @ o_w[rows of head h]
            attn_out = attn_out + jnp.dot(
                ctx_h, o_w_l[lo:lo + HEAD_DIM, :],
                preferred_element_type=jnp.float32)

        h = layer_norm(attn_out + h, ln1_g_ref[l], ln1_b_ref[l])

        # --- feed-forward ---
        inter = jnp.dot(h, i_w_ref[l], preferred_element_type=jnp.float32) + i_b_ref[l]    # (S, I)
        # TODO(synk): tanh-approx GELU; HF default is erf-GELU (~1e-3 level difference).
        c = math.sqrt(2.0 / math.pi)
        inter = 0.5 * inter * (1.0 + jnp.tanh(c * (inter + 0.044715 * inter * inter * inter)))
        ffn_out = jnp.dot(inter, f_w_ref[l], preferred_element_type=jnp.float32) + f_b_ref[l]
        h = layer_norm(ffn_out + h, ln2_g_ref[l], ln2_b_ref[l])

    # --- pooler (first token) + classifier, fused; lane-dense padded output ---
    cls_tok = h[0:1, :]                                                      # (1, H)
    pooled = jnp.tanh(
        jnp.dot(cls_tok, pool_w_ref[...], preferred_element_type=jnp.float32) + pool_b_ref[...])
    logits = jnp.dot(pooled, cls_w_ref[...], preferred_element_type=jnp.float32) + cls_b_ref[...]
    out_ref[0] = logits                                                      # (1, N_PAD)


# ----------------------------- parameters -----------------------------
def init_params(key):
    counter = [0]

    def nxt():
        counter[0] += 1
        return jax.random.fold_in(key, counter[0])

    def normal(shape):
        return (0.02 * jax.random.normal(nxt(), shape)).astype(jnp.float32)

    params = {
        "word_emb": normal((VOCAB, HIDDEN)),
        "pos_emb": normal((MAX_POS, HIDDEN)),
        "type_emb": normal((TYPE_VOCAB, HIDDEN)),
        "emb_ln_g": jnp.ones((HIDDEN,), jnp.float32),
        "emb_ln_b": jnp.zeros((HIDDEN,), jnp.float32),
        "layers": [],
        "pool_w": normal((HIDDEN, HIDDEN)),
        "pool_b": jnp.zeros((HIDDEN,), jnp.float32),
        "cls_w": normal((HIDDEN, N_CLASSES)),
        "cls_b": jnp.zeros((N_CLASSES,), jnp.float32),
    }
    for _ in range(LAYERS):
        params["layers"].append({
            "q_w": normal((HIDDEN, HIDDEN)), "q_b": jnp.zeros((HIDDEN,), jnp.float32),
            "k_w": normal((HIDDEN, HIDDEN)), "k_b": jnp.zeros((HIDDEN,), jnp.float32),
            "v_w": normal((HIDDEN, HIDDEN)), "v_b": jnp.zeros((HIDDEN,), jnp.float32),
            "o_w": normal((HIDDEN, HIDDEN)), "o_b": jnp.zeros((HIDDEN,), jnp.float32),
            "ln1_g": jnp.ones((HIDDEN,), jnp.float32), "ln1_b": jnp.zeros((HIDDEN,), jnp.float32),
            "i_w": normal((HIDDEN, INTERMEDIATE)), "i_b": jnp.zeros((INTERMEDIATE,), jnp.float32),
            "f_w": normal((INTERMEDIATE, HIDDEN)), "f_b": jnp.zeros((HIDDEN,), jnp.float32),
            "ln2_g": jnp.ones((HIDDEN,), jnp.float32), "ln2_b": jnp.zeros((HIDDEN,), jnp.float32),
        })
    return params


# ----------------------------- forward pass -----------------------------
def _rep_spec(arr):
    """Full-array block, replicated across the batch grid axis."""
    zeros = (0,) * arr.ndim
    return pl.BlockSpec(arr.shape, lambda b, z=zeros: z)


def bert_cross_forward(params, input_ids, attention_mask, token_type_ids):
    B, S = input_ids.shape

    # --- embedding gathers are plain-JAX glue; the add + LN happen in-kernel ---
    word = params["word_emb"][input_ids]                       # (B, S, H)
    pos = params["pos_emb"][:S]                                # (S, H)
    tok = params["type_emb"][token_type_ids]                   # (B, S, H)

    # additive attention mask: 0 where attended, -1e9 where padded (kept f32)
    add_mask = ((1.0 - attention_mask.astype(jnp.float32)) * -1e9).reshape(B, 1, S)

    # --- pack per-layer weights: fused QKV, stacked over layers ---
    L = params["layers"]
    qkv_w = jnp.stack([jnp.concatenate([l["q_w"], l["k_w"], l["v_w"]], axis=1) for l in L])   # (L, H, 3H)
    qkv_b = jnp.stack([jnp.concatenate([l["q_b"], l["k_b"], l["v_b"]])[None, :] for l in L])  # (L, 1, 3H)
    o_w = jnp.stack([l["o_w"] for l in L])                     # (L, H, H)
    o_b = jnp.stack([l["o_b"][None, :] for l in L])            # (L, 1, H)
    ln1_g = jnp.stack([l["ln1_g"][None, :] for l in L])
    ln1_b = jnp.stack([l["ln1_b"][None, :] for l in L])
    i_w = jnp.stack([l["i_w"] for l in L])                     # (L, H, I)
    i_b = jnp.stack([l["i_b"][None, :] for l in L])            # (L, 1, I)
    f_w = jnp.stack([l["f_w"] for l in L])                     # (L, I, H)
    f_b = jnp.stack([l["f_b"][None, :] for l in L])            # (L, 1, H)
    ln2_g = jnp.stack([l["ln2_g"][None, :] for l in L])
    ln2_b = jnp.stack([l["ln2_b"][None, :] for l in L])

    emb_g = params["emb_ln_g"][None, :]
    emb_b = params["emb_ln_b"][None, :]
    pool_w = params["pool_w"]
    pool_b = params["pool_b"][None, :]
    # pad classifier to a lane-dense 128-wide output; slice back on host
    cls_w_pad = jnp.zeros((HIDDEN, N_PAD), jnp.float32).at[:, :N_CLASSES].set(params["cls_w"])
    cls_b_pad = jnp.zeros((1, N_PAD), jnp.float32).at[0, :N_CLASSES].set(params["cls_b"])

    weight_args = (emb_g, emb_b, qkv_w, qkv_b, o_w, o_b, ln1_g, ln1_b,
                   i_w, i_b, f_w, f_b, ln2_g, ln2_b, pool_w, pool_b,
                   cls_w_pad, cls_b_pad)

    in_specs = [
        pl.BlockSpec((1, S, HIDDEN), lambda b: (b, 0, 0)),     # word embeddings (per batch)
        _rep_spec(pos),                                        # position embeddings
        pl.BlockSpec((1, S, HIDDEN), lambda b: (b, 0, 0)),     # token-type embeddings (per batch)
        pl.BlockSpec((1, 1, S), lambda b: (b, 0, 0)),          # additive mask (per batch)
    ] + [_rep_spec(w) for w in weight_args]

    logits_pad = pl.pallas_call(
        _bert_kernel,
        out_shape=jax.ShapeDtypeStruct((B, 1, N_PAD), jnp.float32),
        grid=(B,),
        in_specs=in_specs,
        out_specs=pl.BlockSpec((1, 1, N_PAD), lambda b: (b, 0, 0)),
        compiler_params=pltpu.CompilerParams(dimension_semantics=("parallel",)),
    )(word, pos, tok, add_mask, *weight_args)

    return logits_pad.reshape(B, N_PAD)[:, :N_CLASSES]


# ----------------------------- main -----------------------------
if __name__ == "__main__":
    key = jax.random.PRNGKey(0)
    params = init_params(jax.random.fold_in(key, 123))

    input_ids = jax.random.randint(jax.random.fold_in(key, 1), (BATCH, SEQ), 0, VOCAB,
                                   dtype=jnp.int32)
    # simple mask: last two tokens of batch element 1 are padding
    attention_mask = jnp.ones((BATCH, SEQ), jnp.int32).at[1, SEQ - 2:].set(0)
    token_type_ids = jnp.zeros((BATCH, SEQ), jnp.int32)

    forward = jax.jit(bert_cross_forward)
    logits = forward(params, input_ids, attention_mask, token_type_ids)
    logits = jax.block_until_ready(logits)
    assert logits.shape == (BATCH, N_CLASSES)
    assert bool(jnp.all(jnp.isfinite(logits)))
    print("KERNEL_OK")
</pallas_src>

<mosaic_0001>
module attributes {stable_mosaic.version = 11 : i64} {
  func.func @_bert_kernel(%arg0: i32, %arg1: memref<1x8x32xf32, #tpu.memory_space<vmem>>, %arg2: memref<8x32xf32, #tpu.memory_space<vmem>>, %arg3: memref<1x8x32xf32, #tpu.memory_space<vmem>>, %arg4: memref<1x1x8xf32, #tpu.memory_space<vmem>>, %arg5: memref<1x32xf32, #tpu.memory_space<vmem>>, %arg6: memref<1x32xf32, #tpu.memory_space<vmem>>, %arg7: memref<2x32x96xf32, #tpu.memory_space<vmem>>, %arg8: memref<2x1x96xf32, #tpu.memory_space<vmem>>, %arg9: memref<2x32x32xf32, #tpu.memory_space<vmem>>, %arg10: memref<2x1x32xf32, #tpu.memory_space<vmem>>, %arg11: memref<2x1x32xf32, #tpu.memory_space<vmem>>, %arg12: memref<2x1x32xf32, #tpu.memory_space<vmem>>, %arg13: memref<2x32x128xf32, #tpu.memory_space<vmem>>, %arg14: memref<2x1x128xf32, #tpu.memory_space<vmem>>, %arg15: memref<2x128x32xf32, #tpu.memory_space<vmem>>, %arg16: memref<2x1x32xf32, #tpu.memory_space<vmem>>, %arg17: memref<2x1x32xf32, #tpu.memory_space<vmem>>, %arg18: memref<2x1x32xf32, #tpu.memory_space<vmem>>, %arg19: memref<32x32xf32, #tpu.memory_space<vmem>>, %arg20: memref<1x32xf32, #tpu.memory_space<vmem>>, %arg21: memref<32x128xf32, #tpu.memory_space<vmem>>, %arg22: memref<1x128xf32, #tpu.memory_space<vmem>>, %arg23: memref<1x1x128xf32, #tpu.memory_space<vmem>>) attributes {dimension_semantics = [#tpu.dimension_semantics<parallel>], iteration_bounds = array<i64: 2>, scalar_prefetch = 0 : i64, scratch_operands = 0 : i64, tpu.core_type = #tpu.core_type<tc>, window_params = [{transform_indices = @transform_0, window_bounds = array<i64: 1, 8, 32>}, {pipeline_mode = #tpu.pipeline_mode<synchronous>, transform_indices = @transform_1, window_bounds = array<i64: 8, 32>}, {transform_indices = @transform_2, window_bounds = array<i64: 1, 8, 32>}, {transform_indices = @transform_3, window_bounds = array<i64: 1, 1, 8>}, {pipeline_mode = #tpu.pipeline_mode<synchronous>, transform_indices = @transform_4, window_bounds = array<i64: 1, 32>}, {pipeline_mode = #tpu.pipeline_mode<synchronous>, transform_indices = @transform_5, window_bounds = array<i64: 1, 32>}, {pipeline_mode = #tpu.pipeline_mode<synchronous>, transform_indices = @transform_6, window_bounds = array<i64: 2, 32, 96>}, {pipeline_mode = #tpu.pipeline_mode<synchronous>, transform_indices = @transform_7, window_bounds = array<i64: 2, 1, 96>}, {pipeline_mode = #tpu.pipeline_mode<synchronous>, transform_indices = @transform_8, window_bounds = array<i64: 2, 32, 32>}, {pipeline_mode = #tpu.pipeline_mode<synchronous>, transform_indices = @transform_9, window_bounds = array<i64: 2, 1, 32>}, {pipeline_mode = #tpu.pipeline_mode<synchronous>, transform_indices = @transform_10, window_bounds = array<i64: 2, 1, 32>}, {pipeline_mode = #tpu.pipeline_mode<synchronous>, transform_indices = @transform_11, window_bounds = array<i64: 2, 1, 32>}, {pipeline_mode = #tpu.pipeline_mode<synchronous>, transform_indices = @transform_12, window_bounds = array<i64: 2, 32, 128>}, {pipeline_mode = #tpu.pipeline_mode<synchronous>, transform_indices = @transform_13, window_bounds = array<i64: 2, 1, 128>}, {pipeline_mode = #tpu.pipeline_mode<synchronous>, transform_indices = @transform_14, window_bounds = array<i64: 2, 128, 32>}, {pipeline_mode = #tpu.pipeline_mode<synchronous>, transform_indices = @transform_15, window_bounds = array<i64: 2, 1, 32>}, {pipeline_mode = #tpu.pipeline_mode<synchronous>, transform_indices = @transform_16, window_bounds = array<i64: 2, 1, 32>}, {pipeline_mode = #tpu.pipeline_mode<synchronous>, transform_indices = @transform_17, window_bounds = array<i64: 2, 1, 32>}, {pipeline_mode = #tpu.pipeline_mode<synchronous>, transform_indices = @transform_18, window_bounds = array<i64: 32, 32>}, {pipeline_mode = #tpu.pipeline_mode<synchronous>, transform_indices = @transform_19, window_bounds = array<i64: 1, 32>}, {pipeline_mode = #tpu.pipeline_mode<synchronous>, transform_indices = @transform_20, window_bounds = array<i64: 32, 128>}, {pipeline_mode = #tpu.pipeline_mode<synchronous>, transform_indices = @transform_21, window_bounds = array<i64: 1, 128>}, {transform_indices = @transform_22, window_bounds = array<i64: 1, 1, 128>}]} {
    %c0 = arith.constant 0 : index
    %c0_0 = arith.constant 0 : index
    %c0_1 = arith.constant 0 : index
    %0 = vector.load %arg1[%c0, %c0_0, %c0_1] : memref<1x8x32xf32, #tpu.memory_space<vmem>>, vector<1x8x32xf32>
    %1 = vector.shape_cast %0 : vector<1x8x32xf32> to vector<8x32xf32>
    %c0_2 = arith.constant 0 : index
    %c0_3 = arith.constant 0 : index
    %2 = vector.load %arg2[%c0_2, %c0_3] : memref<8x32xf32, #tpu.memory_space<vmem>>, vector<8x32xf32>
    %3 = arith.addf %1, %2 : vector<8x32xf32>
    %c0_4 = arith.constant 0 : index
    %c0_5 = arith.constant 0 : index
    %c0_6 = arith.constant 0 : index
    %4 = vector.load %arg3[%c0_4, %c0_5, %c0_6] : memref<1x8x32xf32, #tpu.memory_space<vmem>>, vector<1x8x32xf32>
    %5 = vector.shape_cast %4 : vector<1x8x32xf32> to vector<8x32xf32>
    %6 = arith.addf %3, %5 : vector<8x32xf32>
    %c0_7 = arith.constant 0 : index
    %c0_8 = arith.constant 0 : index
    %7 = vector.load %arg5[%c0_7, %c0_8] : memref<1x32xf32, #tpu.memory_space<vmem>>, vector<1x32xf32>
    %c0_9 = arith.constant 0 : index
    %c0_10 = arith.constant 0 : index
    %8 = vector.load %arg6[%c0_9, %c0_10] : memref<1x32xf32, #tpu.memory_space<vmem>>, vector<1x32xf32>
    %cst = arith.constant dense<0.000000e+00> : vector<8xf32>
    %9 = vector.multi_reduction <add>, %6, %cst [1] : vector<8x32xf32> to vector<8xf32>
    %10 = vector.shape_cast %9 : vector<8xf32> to vector<8x1xf32>
    %cst_11 = arith.constant 3.200000e+01 : f32
    %11 = vector.broadcast %cst_11 : f32 to vector<8x1xf32>
    %12 = arith.divf %10, %11 : vector<8x1xf32>
    %13 = vector.broadcast %12 : vector<8x1xf32> to vector<8x32xf32>
    %14 = arith.subf %6, %13 : vector<8x32xf32>
    %15 = arith.mulf %14, %14 : vector<8x32xf32>
    %cst_12 = arith.constant dense<0.000000e+00> : vector<8xf32>
    %16 = vector.multi_reduction <add>, %15, %cst_12 [1] : vector<8x32xf32> to vector<8xf32>
    %17 = vector.shape_cast %16 : vector<8xf32> to vector<8x1xf32>
    %cst_13 = arith.constant 3.200000e+01 : f32
    %18 = vector.broadcast %cst_13 : f32 to vector<8x1xf32>
    %19 = arith.divf %17, %18 : vector<8x1xf32>
    %20 = vector.broadcast %12 : vector<8x1xf32> to vector<8x32xf32>
    %21 = arith.subf %6, %20 : vector<8x32xf32>
    %cst_14 = arith.constant 9.99999996E-13 : f32
    %22 = vector.broadcast %cst_14 : f32 to vector<8x1xf32>
    %23 = arith.addf %19, %22 : vector<8x1xf32>
    %24 = math.rsqrt %23 : vector<8x1xf32>
    %25 = vector.broadcast %24 : vector<8x1xf32> to vector<8x32xf32>
    %26 = arith.mulf %21, %25 : vector<8x32xf32>
    %27 = vector.broadcast %7 : vector<1x32xf32> to vector<8x32xf32>
    %28 = arith.mulf %26, %27 : vector<8x32xf32>
    %29 = vector.broadcast %8 : vector<1x32xf32> to vector<8x32xf32>
    %30 = arith.addf %28, %29 : vector<8x32xf32>
    %c0_15 = arith.constant 0 : index
    %c0_16 = arith.constant 0 : index
    %c0_17 = arith.constant 0 : index
    %31 = vector.load %arg4[%c0_15, %c0_16, %c0_17] : memref<1x1x8xf32, #tpu.memory_space<vmem>>, vector<1x1x8xf32>
    %32 = vector.shape_cast %31 : vector<1x1x8xf32> to vector<1x8xf32>
    %c0_18 = arith.constant 0 : index
    %c0_19 = arith.constant 0 : index
    %c0_20 = arith.constant 0 : index
    %33 = vector.load %arg7[%c0_18, %c0_19, %c0_20] : memref<2x32x96xf32, #tpu.memory_space<vmem>>, vector<1x32x96xf32>
    %34 = vector.shape_cast %33 : vector<1x32x96xf32> to vector<32x96xf32>
    %cst_21 = arith.constant dense<0.000000e+00> : vector<8x96xf32>
    %35 = tpu.matmul %30, %34, %cst_21 {dimension_numbers = #tpu.dot_dimension_numbers<[1], [0], [0], [1], [0, 0, 1, 1], [], []>} : vector<8x32xf32>, vector<32x96xf32>, vector<8x96xf32> -> vector<8x96xf32>
    %c0_22 = arith.constant 0 : index
    %c0_23 = arith.constant 0 : index
    %c0_24 = arith.constant 0 : index
    %36 = vector.load %arg8[%c0_22, %c0_23, %c0_24] : memref<2x1x96xf32, #tpu.memory_space<vmem>>, vector<1x1x96xf32>
    %37 = vector.shape_cast %36 : vector<1x1x96xf32> to vector<1x96xf32>
    %38 = vector.broadcast %37 : vector<1x96xf32> to vector<8x96xf32>
    %39 = arith.addf %35, %38 : vector<8x96xf32>
    %c0_25 = arith.constant 0 : index
    %c0_26 = arith.constant 0 : index
    %c0_27 = arith.constant 0 : index
    %40 = vector.load %arg9[%c0_25, %c0_26, %c0_27] : memref<2x32x32xf32, #tpu.memory_space<vmem>>, vector<1x32x32xf32>
    %41 = vector.shape_cast %40 : vector<1x32x32xf32> to vector<32x32xf32>
    %c0_28 = arith.constant 0 : index
    %c0_29 = arith.constant 0 : index
    %c0_30 = arith.constant 0 : index
    %42 = vector.load %arg10[%c0_28, %c0_29, %c0_30] : memref<2x1x32xf32, #tpu.memory_space<vmem>>, vector<1x1x32xf32>
    %43 = vector.shape_cast %42 : vector<1x1x32xf32> to vector<1x32xf32>
    %44 = vector.extract_strided_slice %39 {offsets = [0, 0], sizes = [8, 16], strides = [1, 1]} : vector<8x96xf32> to vector<8x16xf32>
    %45 = vector.extract_strided_slice %39 {offsets = [0, 32], sizes = [8, 16], strides = [1, 1]} : vector<8x96xf32> to vector<8x16xf32>
    %46 = vector.extract_strided_slice %39 {offsets = [0, 64], sizes = [8, 16], strides = [1, 1]} : vector<8x96xf32> to vector<8x16xf32>
    %cst_31 = arith.constant dense<0.000000e+00> : vector<8x8xf32>
    %47 = tpu.matmul %44, %45, %cst_31 {dimension_numbers = #tpu.dot_dimension_numbers<[1], [1], [0], [0], [0, 0, 1, 0], [], []>} : vector<8x16xf32>, vector<8x16xf32>, vector<8x8xf32> -> vector<8x8xf32>
    %cst_32 = arith.constant 2.500000e-01 : f32
    %48 = vector.broadcast %cst_32 : f32 to vector<8x8xf32>
    %49 = arith.mulf %47, %48 : vector<8x8xf32>
    %50 = vector.broadcast %32 : vector<1x8xf32> to vector<8x8xf32>
    %51 = arith.addf %49, %50 : vector<8x8xf32>
    %cst_33 = arith.constant dense<0xFF800000> : vector<8xf32>
    %52 = vector.multi_reduction <maximumf>, %51, %cst_33 [1] : vector<8x8xf32> to vector<8xf32>
    %53 = vector.shape_cast %52 : vector<8xf32> to vector<8x1xf32>
    %54 = vector.broadcast %53 : vector<8x1xf32> to vector<8x8xf32>
    %55 = arith.subf %51, %54 : vector<8x8xf32>
    %56 = math.exp %55 : vector<8x8xf32>
    %cst_34 = arith.constant dense<0.000000e+00> : vector<8xf32>
    %57 = vector.multi_reduction <add>, %56, %cst_34 [1] : vector<8x8xf32> to vector<8xf32>
    %58 = vector.shape_cast %57 : vector<8xf32> to vector<8x1xf32>
    %59 = vector.broadcast %58 : vector<8x1xf32> to vector<8x8xf32>
    %60 = arith.divf %56, %59 : vector<8x8xf32>
    %cst_35 = arith.constant dense<0.000000e+00> : vector<8x16xf32>
    %61 = tpu.matmul %60, %46, %cst_35 {dimension_numbers = #tpu.dot_dimension_numbers<[1], [0], [0], [1], [0, 0, 1, 1], [], []>} : vector<8x8xf32>, vector<8x16xf32>, vector<8x16xf32> -> vector<8x16xf32>
    %62 = vector.extract_strided_slice %41 {offsets = [0, 0], sizes = [16, 32], strides = [1, 1]} : vector<32x32xf32> to vector<16x32xf32>
    %cst_36 = arith.constant dense<0.000000e+00> : vector<8x32xf32>
    %63 = tpu.matmul %61, %62, %cst_36 {dimension_numbers = #tpu.dot_dimension_numbers<[1], [0], [0], [1], [0, 0, 1, 1], [], []>} : vector<8x16xf32>, vector<16x32xf32>, vector<8x32xf32> -> vector<8x32xf32>
    %64 = vector.broadcast %43 : vector<1x32xf32> to vector<8x32xf32>
    %65 = arith.addf %64, %63 : vector<8x32xf32>
    %66 = vector.extract_strided_slice %39 {offsets = [0, 16], sizes = [8, 16], strides = [1, 1]} : vector<8x96xf32> to vector<8x16xf32>
    %67 = vector.extract_strided_slice %39 {offsets = [0, 48], sizes = [8, 16], strides = [1, 1]} : vector<8x96xf32> to vector<8x16xf32>
    %68 = vector.extract_strided_slice %39 {offsets = [0, 80], sizes = [8, 16], strides = [1, 1]} : vector<8x96xf32> to vector<8x16xf32>
    %cst_37 = arith.constant dense<0.000000e+00> : vector<8x8xf32>
    %69 = tpu.matmul %66, %67, %cst_37 {dimension_numbers = #tpu.dot_dimension_numbers<[1], [1], [0], [0], [0, 0, 1, 0], [], []>} : vector<8x16xf32>, vector<8x16xf32>, vector<8x8xf32> -> vector<8x8xf32>
    %cst_38 = arith.constant 2.500000e-01 : f32
    %70 = vector.broadcast %cst_38 : f32 to vector<8x8xf32>
    %71 = arith.mulf %69, %70 : vector<8x8xf32>
    %72 = vector.broadcast %32 : vector<1x8xf32> to vector<8x8xf32>
    %73 = arith.addf %71, %72 : vector<8x8xf32>
    %cst_39 = arith.constant dense<0xFF800000> : vector<8xf32>
    %74 = vector.multi_reduction <maximumf>, %73, %cst_39 [1] : vector<8x8xf32> to vector<8xf32>
    %75 = vector.shape_cast %74 : vector<8xf32> to vector<8x1xf32>
    %76 = vector.broadcast %75 : vector<8x1xf32> to vector<8x8xf32>
    %77 = arith.subf %73, %76 : vector<8x8xf32>
    %78 = math.exp %77 : vector<8x8xf32>
    %cst_40 = arith.constant dense<0.000000e+00> : vector<8xf32>
    %79 = vector.multi_reduction <add>, %78, %cst_40 [1] : vector<8x8xf32> to vector<8xf32>
    %80 = vector.shape_cast %79 : vector<8xf32> to vector<8x1xf32>
    %81 = vector.broadcast %80 : vector<8x1xf32> to vector<8x8xf32>
    %82 = arith.divf %78, %81 : vector<8x8xf32>
    %cst_41 = arith.constant dense<0.000000e+00> : vector<8x16xf32>
    %83 = tpu.matmul %82, %68, %cst_41 {dimension_numbers = #tpu.dot_dimension_numbers<[1], [0], [0], [1], [0, 0, 1, 1], [], []>} : vector<8x8xf32>, vector<8x16xf32>, vector<8x16xf32> -> vector<8x16xf32>
    %84 = vector.extract_strided_slice %41 {offsets = [16, 0], sizes = [16, 32], strides = [1, 1]} : vector<32x32xf32> to vector<16x32xf32>
    %cst_42 = arith.constant dense<0.000000e+00> : vector<8x32xf32>
    %85 = tpu.matmul %83, %84, %cst_42 {dimension_numbers = #tpu.dot_dimension_numbers<[1], [0], [0], [1], [0, 0, 1, 1], [], []>} : vector<8x16xf32>, vector<16x32xf32>, vector<8x32xf32> -> vector<8x32xf32>
    %86 = arith.addf %65, %85 : vector<8x32xf32>
    %87 = arith.addf %86, %30 : vector<8x32xf32>
    %c0_43 = arith.constant 0 : index
    %c0_44 = arith.constant 0 : index
    %c0_45 = arith.constant 0 : index
    %88 = vector.load %arg11[%c0_43, %c0_44, %c0_45] : memref<2x1x32xf32, #tpu.memory_space<vmem>>, vector<1x1x32xf32>
    %89 = vector.shape_cast %88 : vector<1x1x32xf32> to vector<1x32xf32>
    %c0_46 = arith.constant 0 : index
    %c0_47 = arith.constant 0 : index
    %c0_48 = arith.constant 0 : index
    %90 = vector.load %arg12[%c0_46, %c0_47, %c0_48] : memref<2x1x32xf32, #tpu.memory_space<vmem>>, vector<1x1x32xf32>
    %91 = vector.shape_cast %90 : vector<1x1x32xf32> to vector<1x32xf32>
    %cst_49 = arith.constant dense<0.000000e+00> : vector<8xf32>
    %92 = vector.multi_reduction <add>, %87, %cst_49 [1] : vector<8x32xf32> to vector<8xf32>
    %93 = vector.shape_cast %92 : vector<8xf32> to vector<8x1xf32>
    %cst_50 = arith.constant 3.200000e+01 : f32
    %94 = vector.broadcast %cst_50 : f32 to vector<8x1xf32>
    %95 = arith.divf %93, %94 : vector<8x1xf32>
    %96 = vector.broadcast %95 : vector<8x1xf32> to vector<8x32xf32>
    %97 = arith.subf %87, %96 : vector<8x32xf32>
    %98 = arith.mulf %97, %97 : vector<8x32xf32>
    %cst_51 = arith.constant dense<0.000000e+00> : vector<8xf32>
    %99 = vector.multi_reduction <add>, %98, %cst_51 [1] : vector<8x32xf32> to vector<8xf32>
    %100 = vector.shape_cast %99 : vector<8xf32> to vector<8x1xf32>
    %cst_52 = arith.constant 3.200000e+01 : f32
    %101 = vector.broadcast %cst_52 : f32 to vector<8x1xf32>
    %102 = arith.divf %100, %101 : vector<8x1xf32>
    %103 = vector.broadcast %95 : vector<8x1xf32> to vector<8x32xf32>
    %104 = arith.subf %87, %103 : vector<8x32xf32>
    %cst_53 = arith.constant 9.99999996E-13 : f32
    %105 = vector.broadcast %cst_53 : f32 to vector<8x1xf32>
    %106 = arith.addf %102, %105 : vector<8x1xf32>
    %107 = math.rsqrt %106 : vector<8x1xf32>
    %108 = vector.broadcast %107 : vector<8x1xf32> to vector<8x32xf32>
    %109 = arith.mulf %104, %108 : vector<8x32xf32>
    %110 = vector.broadcast %89 : vector<1x32xf32> to vector<8x32xf32>
    %111 = arith.mulf %109, %110 : vector<8x32xf32>
    %112 = vector.broadcast %91 : vector<1x32xf32> to vector<8x32xf32>
    %113 = arith.addf %111, %112 : vector<8x32xf32>
    %c0_54 = arith.constant 0 : index
    %c0_55 = arith.constant 0 : index
    %c0_56 = arith.constant 0 : index
    %114 = vector.load %arg13[%c0_54, %c0_55, %c0_56] : memref<2x32x128xf32, #tpu.memory_space<vmem>>, vector<1x32x128xf32>
    %115 = vector.shape_cast %114 : vector<1x32x128xf32> to vector<32x128xf32>
    %cst_57 = arith.constant dense<0.000000e+00> : vector<8x128xf32>
    %116 = tpu.matmul %113, %115, %cst_57 {dimension_numbers = #tpu.dot_dimension_numbers<[1], [0], [0], [1], [0, 0, 1, 1], [], []>} : vector<8x32xf32>, vector<32x128xf32>, vector<8x128xf32> -> vector<8x128xf32>
    %c0_58 = arith.constant 0 : index
    %c0_59 = arith.constant 0 : index
    %c0_60 = arith.constant 0 : index
    %117 = vector.load %arg14[%c0_58, %c0_59, %c0_60] : memref<2x1x128xf32, #tpu.memory_space<vmem>>, vector<1x1x128xf32>
    %118 = vector.shape_cast %117 : vector<1x1x128xf32> to vector<1x128xf32>
    %119 = vector.broadcast %118 : vector<1x128xf32> to vector<8x128xf32>
    %120 = arith.addf %116, %119 : vector<8x128xf32>
    %cst_61 = arith.constant 5.000000e-01 : f32
    %121 = vector.broadcast %cst_61 : f32 to vector<8x128xf32>
    %122 = arith.mulf %121, %120 : vector<8x128xf32>
    %cst_62 = arith.constant 4.471500e-02 : f32
    %123 = vector.broadcast %cst_62 : f32 to vector<8x128xf32>
    %124 = arith.mulf %123, %120 : vector<8x128xf32>
    %125 = arith.mulf %124, %120 : vector<8x128xf32>
    %126 = arith.mulf %125, %120 : vector<8x128xf32>
    %127 = arith.addf %120, %126 : vector<8x128xf32>
    %cst_63 = arith.constant 0.797884583 : f32
    %128 = vector.broadcast %cst_63 : f32 to vector<8x128xf32>
    %129 = arith.mulf %128, %127 : vector<8x128xf32>
    %130 = math.tanh %129 : vector<8x128xf32>
    %cst_64 = arith.constant 1.000000e+00 : f32
    %131 = vector.broadcast %cst_64 : f32 to vector<8x128xf32>
    %132 = arith.addf %131, %130 : vector<8x128xf32>
    %133 = arith.mulf %122, %132 : vector<8x128xf32>
    %c0_65 = arith.constant 0 : index
    %c0_66 = arith.constant 0 : index
    %c0_67 = arith.constant 0 : index
    %134 = vector.load %arg15[%c0_65, %c0_66, %c0_67] : memref<2x128x32xf32, #tpu.memory_space<vmem>>, vector<1x128x32xf32>
    %135 = vector.shape_cast %134 : vector<1x128x32xf32> to vector<128x32xf32>
    %cst_68 = arith.constant dense<0.000000e+00> : vector<8x32xf32>
    %136 = tpu.matmul %133, %135, %cst_68 {dimension_numbers = #tpu.dot_dimension_numbers<[1], [0], [0], [1], [0, 0, 1, 1], [], []>} : vector<8x128xf32>, vector<128x32xf32>, vector<8x32xf32> -> vector<8x32xf32>
    %c0_69 = arith.constant 0 : index
    %c0_70 = arith.constant 0 : index
    %c0_71 = arith.constant 0 : index
    %137 = vector.load %arg16[%c0_69, %c0_70, %c0_71] : memref<2x1x32xf32, #tpu.memory_space<vmem>>, vector<1x1x32xf32>
    %138 = vector.shape_cast %137 : vector<1x1x32xf32> to vector<1x32xf32>
    %139 = vector.broadcast %138 : vector<1x32xf32> to vector<8x32xf32>
    %140 = arith.addf %136, %139 : vector<8x32xf32>
    %141 = arith.addf %140, %113 : vector<8x32xf32>
    %c0_72 = arith.constant 0 : index
    %c0_73 = arith.constant 0 : index
    %c0_74 = arith.constant 0 : index
    %142 = vector.load %arg17[%c0_72, %c0_73, %c0_74] : memref<2x1x32xf32, #tpu.memory_space<vmem>>, vector<1x1x32xf32>
    %143 = vector.shape_cast %142 : vector<1x1x32xf32> to vector<1x32xf32>
    %c0_75 = arith.constant 0 : index
    %c0_76 = arith.constant 0 : index
    %c0_77 = arith.constant 0 : index
    %144 = vector.load %arg18[%c0_75, %c0_76, %c0_77] : memref<2x1x32xf32, #tpu.memory_space<vmem>>, vector<1x1x32xf32>
    %145 = vector.shape_cast %144 : vector<1x1x32xf32> to vector<1x32xf32>
    %cst_78 = arith.constant dense<0.000000e+00> : vector<8xf32>
    %146 = vector.multi_reduction <add>, %141, %cst_78 [1] : vector<8x32xf32> to vector<8xf32>
    %147 = vector.shape_cast %146 : vector<8xf32> to vector<8x1xf32>
    %cst_79 = arith.constant 3.200000e+01 : f32
    %148 = vector.broadcast %cst_79 : f32 to vector<8x1xf32>
    %149 = arith.divf %147, %148 : vector<8x1xf32>
    %150 = vector.broadcast %149 : vector<8x1xf32> to vector<8x32xf32>
    %151 = arith.subf %141, %150 : vector<8x32xf32>
    %152 = arith.mulf %151, %151 : vector<8x32xf32>
    %cst_80 = arith.constant dense<0.000000e+00> : vector<8xf32>
    %153 = vector.multi_reduction <add>, %152, %cst_80 [1] : vector<8x32xf32> to vector<8xf32>
    %154 = vector.shape_cast %153 : vector<8xf32> to vector<8x1xf32>
    %cst_81 = arith.constant 3.200000e+01 : f32
    %155 = vector.broadcast %cst_81 : f32 to vector<8x1xf32>
    %156 = arith.divf %154, %155 : vector<8x1xf32>
    %157 = vector.broadcast %149 : vector<8x1xf32> to vector<8x32xf32>
    %158 = arith.subf %141, %157 : vector<8x32xf32>
    %cst_82 = arith.constant 9.99999996E-13 : f32
    %159 = vector.broadcast %cst_82 : f32 to vector<8x1xf32>
    %160 = arith.addf %156, %159 : vector<8x1xf32>
    %161 = math.rsqrt %160 : vector<8x1xf32>
    %162 = vector.broadcast %161 : vector<8x1xf32> to vector<8x32xf32>
    %163 = arith.mulf %158, %162 : vector<8x32xf32>
    %164 = vector.broadcast %143 : vector<1x32xf32> to vector<8x32xf32>
    %165 = arith.mulf %163, %164 : vector<8x32xf32>
    %166 = vector.broadcast %145 : vector<1x32xf32> to vector<8x32xf32>
    %167 = arith.addf %165, %166 : vector<8x32xf32>
    %c1 = arith.constant 1 : index
    %c0_83 = arith.constant 0 : index
    %c0_84 = arith.constant 0 : index
    %168 = vector.load %arg7[%c1, %c0_83, %c0_84] : memref<2x32x96xf32, #tpu.memory_space<vmem>>, vector<1x32x96xf32>
    %169 = vector.shape_cast %168 : vector<1x32x96xf32> to vector<32x96xf32>
    %cst_85 = arith.constant dense<0.000000e+00> : vector<8x96xf32>
    %170 = tpu.matmul %167, %169, %cst_85 {dimension_numbers = #tpu.dot_dimension_numbers<[1], [0], [0], [1], [0, 0, 1, 1], [], []>} : vector<8x32xf32>, vector<32x96xf32>, vector<8x96xf32> -> vector<8x96xf32>
    %c1_86 = arith.constant 1 : index
    %c0_87 = arith.constant 0 : index
    %c0_88 = arith.constant 0 : index
    %171 = vector.load %arg8[%c1_86, %c0_87, %c0_88] : memref<2x1x96xf32, #tpu.memory_space<vmem>>, vector<1x1x96xf32>
    %172 = vector.shape_cast %171 : vector<1x1x96xf32> to vector<1x96xf32>
    %173 = vector.broadcast %172 : vector<1x96xf32> to vector<8x96xf32>
    %174 = arith.addf %170, %173 : vector<8x96xf32>
    %c1_89 = arith.constant 1 : index
    %c0_90 = arith.constant 0 : index
    %c0_91 = arith.constant 0 : index
    %175 = vector.load %arg9[%c1_89, %c0_90, %c0_91] : memref<2x32x32xf32, #tpu.memory_space<vmem>>, vector<1x32x32xf32>
    %176 = vector.shape_cast %175 : vector<1x32x32xf32> to vector<32x32xf32>
    %c1_92 = arith.constant 1 : index
    %c0_93 = arith.constant 0 : index
    %c0_94 = arith.constant 0 : index
    %177 = vector.load %arg10[%c1_92, %c0_93, %c0_94] : memref<2x1x32xf32, #tpu.memory_space<vmem>>, vector<1x1x32xf32>
    %178 = vector.shape_cast %177 : vector<1x1x32xf32> to vector<1x32xf32>
    %179 = vector.extract_strided_slice %174 {offsets = [0, 0], sizes = [8, 16], strides = [1, 1]} : vector<8x96xf32> to vector<8x16xf32>
    %180 = vector.extract_strided_slice %174 {offsets = [0, 32], sizes = [8, 16], strides = [1, 1]} : vector<8x96xf32> to vector<8x16xf32>
    %181 = vector.extract_strided_slice %174 {offsets = [0, 64], sizes = [8, 16], strides = [1, 1]} : vector<8x96xf32> to vector<8x16xf32>
    %cst_95 = arith.constant dense<0.000000e+00> : vector<8x8xf32>
    %182 = tpu.matmul %179, %180, %cst_95 {dimension_numbers = #tpu.dot_dimension_numbers<[1], [1], [0], [0], [0, 0, 1, 0], [], []>} : vector<8x16xf32>, vector<8x16xf32>, vector<8x8xf32> -> vector<8x8xf32>
    %cst_96 = arith.constant 2.500000e-01 : f32
    %183 = vector.broadcast %cst_96 : f32 to vector<8x8xf32>
    %184 = arith.mulf %182, %183 : vector<8x8xf32>
    %185 = vector.broadcast %32 : vector<1x8xf32> to vector<8x8xf32>
    %186 = arith.addf %184, %185 : vector<8x8xf32>
    %cst_97 = arith.constant dense<0xFF800000> : vector<8xf32>
    %187 = vector.multi_reduction <maximumf>, %186, %cst_97 [1] : vector<8x8xf32> to vector<8xf32>
    %188 = vector.shape_cast %187 : vector<8xf32> to vector<8x1xf32>
    %189 = vector.broadcast %188 : vector<8x1xf32> to vector<8x8xf32>
    %190 = arith.subf %186, %189 : vector<8x8xf32>
    %191 = math.exp %190 : vector<8x8xf32>
    %cst_98 = arith.constant dense<0.000000e+00> : vector<8xf32>
    %192 = vector.multi_reduction <add>, %191, %cst_98 [1] : vector<8x8xf32> to vector<8xf32>
    %193 = vector.shape_cast %192 : vector<8xf32> to vector<8x1xf32>
    %194 = vector.broadcast %193 : vector<8x1xf32> to vector<8x8xf32>
    %195 = arith.divf %191, %194 : vector<8x8xf32>
    %cst_99 = arith.constant dense<0.000000e+00> : vector<8x16xf32>
    %196 = tpu.matmul %195, %181, %cst_99 {dimension_numbers = #tpu.dot_dimension_numbers<[1], [0], [0], [1], [0, 0, 1, 1], [], []>} : vector<8x8xf32>, vector<8x16xf32>, vector<8x16xf32> -> vector<8x16xf32>
    %197 = vector.extract_strided_slice %176 {offsets = [0, 0], sizes = [16, 32], strides = [1, 1]} : vector<32x32xf32> to vector<16x32xf32>
    %cst_100 = arith.constant dense<0.000000e+00> : vector<8x32xf32>
    %198 = tpu.matmul %196, %197, %cst_100 {dimension_numbers = #tpu.dot_dimension_numbers<[1], [0], [0], [1], [0, 0, 1, 1], [], []>} : vector<8x16xf32>, vector<16x32xf32>, vector<8x32xf32> -> vector<8x32xf32>
    %199 = vector.broadcast %178 : vector<1x32xf32> to vector<8x32xf32>
    %200 = arith.addf %199, %198 : vector<8x32xf32>
    %201 = vector.extract_strided_slice %174 {offsets = [0, 16], sizes = [8, 16], strides = [1, 1]} : vector<8x96xf32> to vector<8x16xf32>
    %202 = vector.extract_strided_slice %174 {offsets = [0, 48], sizes = [8, 16], strides = [1, 1]} : vector<8x96xf32> to vector<8x16xf32>
    %203 = vector.extract_strided_slice %174 {offsets = [0, 80], sizes = [8, 16], strides = [1, 1]} : vector<8x96xf32> to vector<8x16xf32>
    %cst_101 = arith.constant dense<0.000000e+00> : vector<8x8xf32>
    %204 = tpu.matmul %201, %202, %cst_101 {dimension_numbers = #tpu.dot_dimension_numbers<[1], [1], [0], [0], [0, 0, 1, 0], [], []>} : vector<8x16xf32>, vector<8x16xf32>, vector<8x8xf32> -> vector<8x8xf32>
    %cst_102 = arith.constant 2.500000e-01 : f32
    %205 = vector.broadcast %cst_102 : f32 to vector<8x8xf32>
    %206 = arith.mulf %204, %205 : vector<8x8xf32>
    %207 = vector.broadcast %32 : vector<1x8xf32> to vector<8x8xf32>
    %208 = arith.addf %206, %207 : vector<8x8xf32>
    %cst_103 = arith.constant dense<0xFF800000> : vector<8xf32>
    %209 = vector.multi_reduction <maximumf>, %208, %cst_103 [1] : vector<8x8xf32> to vector<8xf32>
    %210 = vector.shape_cast %209 : vector<8xf32> to vector<8x1xf32>
    %211 = vector.broadcast %210 : vector<8x1xf32> to vector<8x8xf32>
    %212 = arith.subf %208, %211 : vector<8x8xf32>
    %213 = math.exp %212 : vector<8x8xf32>
    %cst_104 = arith.constant dense<0.000000e+00> : vector<8xf32>
    %214 = vector.multi_reduction <add>, %213, %cst_104 [1] : vector<8x8xf32> to vector<8xf32>
    %215 = vector.shape_cast %214 : vector<8xf32> to vector<8x1xf32>
    %216 = vector.broadcast %215 : vector<8x1xf32> to vector<8x8xf32>
    %217 = arith.divf %213, %216 : vector<8x8xf32>
    %cst_105 = arith.constant dense<0.000000e+00> : vector<8x16xf32>
    %218 = tpu.matmul %217, %203, %cst_105 {dimension_numbers = #tpu.dot_dimension_numbers<[1], [0], [0], [1], [0, 0, 1, 1], [], []>} : vector<8x8xf32>, vector<8x16xf32>, vector<8x16xf32> -> vector<8x16xf32>
    %219 = vector.extract_strided_slice %176 {offsets = [16, 0], sizes = [16, 32], strides = [1, 1]} : vector<32x32xf32> to vector<16x32xf32>
    %cst_106 = arith.constant dense<0.000000e+00> : vector<8x32xf32>
    %220 = tpu.matmul %218, %219, %cst_106 {dimension_numbers = #tpu.dot_dimension_numbers<[1], [0], [0], [1], [0, 0, 1, 1], [], []>} : vector<8x16xf32>, vector<16x32xf32>, vector<8x32xf32> -> vector<8x32xf32>
    %221 = arith.addf %200, %220 : vector<8x32xf32>
    %222 = arith.addf %221, %167 : vector<8x32xf32>
    %c1_107 = arith.constant 1 : index
    %c0_108 = arith.constant 0 : index
    %c0_109 = arith.constant 0 : index
    %223 = vector.load %arg11[%c1_107, %c0_108, %c0_109] : memref<2x1x32xf32, #tpu.memory_space<vmem>>, vector<1x1x32xf32>
    %224 = vector.shape_cast %223 : vector<1x1x32xf32> to vector<1x32xf32>
    %c1_110 = arith.constant 1 : index
    %c0_111 = arith.constant 0 : index
    %c0_112 = arith.constant 0 : index
    %225 = vector.load %arg12[%c1_110, %c0_111, %c0_112] : memref<2x1x32xf32, #tpu.memory_space<vmem>>, vector<1x1x32xf32>
    %226 = vector.shape_cast %225 : vector<1x1x32xf32> to vector<1x32xf32>
    %cst_113 = arith.constant dense<0.000000e+00> : vector<8xf32>
    %227 = vector.multi_reduction <add>, %222, %cst_113 [1] : vector<8x32xf32> to vector<8xf32>
    %228 = vector.shape_cast %227 : vector<8xf32> to vector<8x1xf32>
    %cst_114 = arith.constant 3.200000e+01 : f32
    %229 = vector.broadcast %cst_114 : f32 to vector<8x1xf32>
    %230 = arith.divf %228, %229 : vector<8x1xf32>
    %231 = vector.broadcast %230 : vector<8x1xf32> to vector<8x32xf32>
    %232 = arith.subf %222, %231 : vector<8x32xf32>
    %233 = arith.mulf %232, %232 : vector<8x32xf32>
    %cst_115 = arith.constant dense<0.000000e+00> : vector<8xf32>
    %234 = vector.multi_reduction <add>, %233, %cst_115 [1] : vector<8x32xf32> to vector<8xf32>
    %235 = vector.shape_cast %234 : vector<8xf32> to vector<8x1xf32>
    %cst_116 = arith.constant 3.200000e+01 : f32
    %236 = vector.broadcast %cst_116 : f32 to vector<8x1xf32>
    %237 = arith.divf %235, %236 : vector<8x1xf32>
    %238 = vector.broadcast %230 : vector<8x1xf32> to vector<8x32xf32>
    %239 = arith.subf %222, %238 : vector<8x32xf32>
    %cst_117 = arith.constant 9.99999996E-13 : f32
    %240 = vector.broadcast %cst_117 : f32 to vector<8x1xf32>
    %241 = arith.addf %237, %240 : vector<8x1xf32>
    %242 = math.rsqrt %241 : vector<8x1xf32>
    %243 = vector.broadcast %242 : vector<8x1xf32> to vector<8x32xf32>
    %244 = arith.mulf %239, %243 : vector<8x32xf32>
    %245 = vector.broadcast %224 : vector<1x32xf32> to vector<8x32xf32>
    %246 = arith.mulf %244, %245 : vector<8x32xf32>
    %247 = vector.broadcast %226 : vector<1x32xf32> to vector<8x32xf32>
    %248 = arith.addf %246, %247 : vector<8x32xf32>
    %c1_118 = arith.constant 1 : index
    %c0_119 = arith.constant 0 : index
    %c0_120 = arith.constant 0 : index
    %249 = vector.load %arg13[%c1_118, %c0_119, %c0_120] : memref<2x32x128xf32, #tpu.memory_space<vmem>>, vector<1x32x128xf32>
    %250 = vector.shape_cast %249 : vector<1x32x128xf32> to vector<32x128xf32>
    %cst_121 = arith.constant dense<0.000000e+00> : vector<8x128xf32>
    %251 = tpu.matmul %248, %250, %cst_121 {dimension_numbers = #tpu.dot_dimension_numbers<[1], [0], [0], [1], [0, 0, 1, 1], [], []>} : vector<8x32xf32>, vector<32x128xf32>, vector<8x128xf32> -> vector<8x128xf32>
    %c1_122 = arith.constant 1 : index
    %c0_123 = arith.constant 0 : index
    %c0_124 = arith.constant 0 : index
    %252 = vector.load %arg14[%c1_122, %c0_123, %c0_124] : memref<2x1x128xf32, #tpu.memory_space<vmem>>, vector<1x1x128xf32>
    %253 = vector.shape_cast %252 : vector<1x1x128xf32> to vector<1x128xf32>
    %254 = vector.broadcast %253 : vector<1x128xf32> to vector<8x128xf32>
    %255 = arith.addf %251, %254 : vector<8x128xf32>
    %cst_125 = arith.constant 5.000000e-01 : f32
    %256 = vector.broadcast %cst_125 : f32 to vector<8x128xf32>
    %257 = arith.mulf %256, %255 : vector<8x128xf32>
    %cst_126 = arith.constant 4.471500e-02 : f32
    %258 = vector.broadcast %cst_126 : f32 to vector<8x128xf32>
    %259 = arith.mulf %258, %255 : vector<8x128xf32>
    %260 = arith.mulf %259, %255 : vector<8x128xf32>
    %261 = arith.mulf %260, %255 : vector<8x128xf32>
    %262 = arith.addf %255, %261 : vector<8x128xf32>
    %cst_127 = arith.constant 0.797884583 : f32
    %263 = vector.broadcast %cst_127 : f32 to vector<8x128xf32>
    %264 = arith.mulf %263, %262 : vector<8x128xf32>
    %265 = math.tanh %264 : vector<8x128xf32>
    %cst_128 = arith.constant 1.000000e+00 : f32
    %266 = vector.broadcast %cst_128 : f32 to vector<8x128xf32>
    %267 = arith.addf %266, %265 : vector<8x128xf32>
    %268 = arith.mulf %257, %267 : vector<8x128xf32>
    %c1_129 = arith.constant 1 : index
    %c0_130 = arith.constant 0 : index
    %c0_131 = arith.constant 0 : index
    %269 = vector.load %arg15[%c1_129, %c0_130, %c0_131] : memref<2x128x32xf32, #tpu.memory_space<vmem>>, vector<1x128x32xf32>
    %270 = vector.shape_cast %269 : vector<1x128x32xf32> to vector<128x32xf32>
    %cst_132 = arith.constant dense<0.000000e+00> : vector<8x32xf32>
    %271 = tpu.matmul %268, %270, %cst_132 {dimension_numbers = #tpu.dot_dimension_numbers<[1], [0], [0], [1], [0, 0, 1, 1], [], []>} : vector<8x128xf32>, vector<128x32xf32>, vector<8x32xf32> -> vector<8x32xf32>
    %c1_133 = arith.constant 1 : index
    %c0_134 = arith.constant 0 : index
    %c0_135 = arith.constant 0 : index
    %272 = vector.load %arg16[%c1_133, %c0_134, %c0_135] : memref<2x1x32xf32, #tpu.memory_space<vmem>>, vector<1x1x32xf32>
    %273 = vector.shape_cast %272 : vector<1x1x32xf32> to vector<1x32xf32>
    %274 = vector.broadcast %273 : vector<1x32xf32> to vector<8x32xf32>
    %275 = arith.addf %271, %274 : vector<8x32xf32>
    %276 = arith.addf %275, %248 : vector<8x32xf32>
    %c1_136 = arith.constant 1 : index
    %c0_137 = arith.constant 0 : index
    %c0_138 = arith.constant 0 : index
    %277 = vector.load %arg17[%c1_136, %c0_137, %c0_138] : memref<2x1x32xf32, #tpu.memory_space<vmem>>, vector<1x1x32xf32>
    %278 = vector.shape_cast %277 : vector<1x1x32xf32> to vector<1x32xf32>
    %c1_139 = arith.constant 1 : index
    %c0_140 = arith.constant 0 : index
    %c0_141 = arith.constant 0 : index
    %279 = vector.load %arg18[%c1_139, %c0_140, %c0_141] : memref<2x1x32xf32, #tpu.memory_space<vmem>>, vector<1x1x32xf32>
    %280 = vector.shape_cast %279 : vector<1x1x32xf32> to vector<1x32xf32>
    %cst_142 = arith.constant dense<0.000000e+00> : vector<8xf32>
    %281 = vector.multi_reduction <add>, %276, %cst_142 [1] : vector<8x32xf32> to vector<8xf32>
    %282 = vector.shape_cast %281 : vector<8xf32> to vector<8x1xf32>
    %cst_143 = arith.constant 3.200000e+01 : f32
    %283 = vector.broadcast %cst_143 : f32 to vector<8x1xf32>
    %284 = arith.divf %282, %283 : vector<8x1xf32>
    %285 = vector.broadcast %284 : vector<8x1xf32> to vector<8x32xf32>
    %286 = arith.subf %276, %285 : vector<8x32xf32>
    %287 = arith.mulf %286, %286 : vector<8x32xf32>
    %cst_144 = arith.constant dense<0.000000e+00> : vector<8xf32>
    %288 = vector.multi_reduction <add>, %287, %cst_144 [1] : vector<8x32xf32> to vector<8xf32>
    %289 = vector.shape_cast %288 : vector<8xf32> to vector<8x1xf32>
    %cst_145 = arith.constant 3.200000e+01 : f32
    %290 = vector.broadcast %cst_145 : f32 to vector<8x1xf32>
    %291 = arith.divf %289, %290 : vector<8x1xf32>
    %292 = vector.broadcast %284 : vector<8x1xf32> to vector<8x32xf32>
    %293 = arith.subf %276, %292 : vector<8x32xf32>
    %cst_146 = arith.constant 9.99999996E-13 : f32
    %294 = vector.broadcast %cst_146 : f32 to vector<8x1xf32>
    %295 = arith.addf %291, %294 : vector<8x1xf32>
    %296 = math.rsqrt %295 : vector<8x1xf32>
    %297 = vector.broadcast %296 : vector<8x1xf32> to vector<8x32xf32>
    %298 = arith.mulf %293, %297 : vector<8x32xf32>
    %299 = vector.broadcast %278 : vector<1x32xf32> to vector<8x32xf32>
    %300 = arith.mulf %298, %299 : vector<8x32xf32>
    %301 = vector.broadcast %280 : vector<1x32xf32> to vector<8x32xf32>
    %302 = arith.addf %300, %301 : vector<8x32xf32>
    %303 = vector.extract_strided_slice %302 {offsets = [0, 0], sizes = [1, 32], strides = [1, 1]} : vector<8x32xf32> to vector<1x32xf32>
    %c0_147 = arith.constant 0 : index
    %c0_148 = arith.constant 0 : index
    %304 = vector.load %arg19[%c0_147, %c0_148] : memref<32x32xf32, #tpu.memory_space<vmem>>, vector<32x32xf32>
    %cst_149 = arith.constant dense<0.000000e+00> : vector<1x32xf32>
    %305 = tpu.matmul %303, %304, %cst_149 {dimension_numbers = #tpu.dot_dimension_numbers<[1], [0], [0], [1], [0, 0, 1, 1], [], []>} : vector<1x32xf32>, vector<32x32xf32>, vector<1x32xf32> -> vector<1x32xf32>
    %c0_150 = arith.constant 0 : index
    %c0_151 = arith.constant 0 : index
    %306 = vector.load %arg20[%c0_150, %c0_151] : memref<1x32xf32, #tpu.memory_space<vmem>>, vector<1x32xf32>
    %307 = arith.addf %305, %306 : vector<1x32xf32>
    %308 = math.tanh %307 : vector<1x32xf32>
    %c0_152 = arith.constant 0 : index
    %c0_153 = arith.constant 0 : index
    %309 = vector.load %arg21[%c0_152, %c0_153] : memref<32x128xf32, #tpu.memory_space<vmem>>, vector<32x128xf32>
    %cst_154 = arith.constant dense<0.000000e+00> : vector<1x128xf32>
    %310 = tpu.matmul %308, %309, %cst_154 {dimension_numbers = #tpu.dot_dimension_numbers<[1], [0], [0], [1], [0, 0, 1, 1], [], []>} : vector<1x32xf32>, vector<32x128xf32>, vector<1x128xf32> -> vector<1x128xf32>
    %c0_155 = arith.constant 0 : index
    %c0_156 = arith.constant 0 : index
    %311 = vector.load %arg22[%c0_155, %c0_156] : memref<1x128xf32, #tpu.memory_space<vmem>>, vector<1x128xf32>
    %312 = arith.addf %310, %311 : vector<1x128xf32>
    %c0_157 = arith.constant 0 : index
    %c0_158 = arith.constant 0 : index
    %c0_159 = arith.constant 0 : index
    %313 = vector.load %arg23[%c0_157, %c0_158, %c0_159] : memref<1x1x128xf32, #tpu.memory_space<vmem>>, vector<1x1x128xf32>
    %314 = vector.shape_cast %313 : vector<1x1x128xf32> to vector<1x128xf32>
    %315 = vector.shape_cast %312 : vector<1x128xf32> to vector<1x1x128xf32>
    tpu.vector_store %arg23[%c0_157, %c0_158, %c0_159], %315 {strides = array<i32>} : memref<1x1x128xf32, #tpu.memory_space<vmem>>, vector<1x1x128xf32>,
    return
  }
  func.func @transform_0(%arg0: i32) -> (i32, i32, i32) {
    %c0_i32 = arith.constant 0 : i32
    %c0_i32_0 = arith.constant 0 : i32
    %c0_i32_1 = arith.constant 0 : i32
    return %arg0, %c0_i32, %c0_i32_0 : i32, i32, i32
  }
  func.func @transform_1(%arg0: i32) -> (i32, i32) {
    %c0_i32 = arith.constant 0 : i32
    %c0_i32_0 = arith.constant 0 : i32
    %c0_i32_1 = arith.constant 0 : i32
    return %c0_i32, %c0_i32_0 : i32, i32
  }
  func.func @transform_2(%arg0: i32) -> (i32, i32, i32) {
    %c0_i32 = arith.constant 0 : i32
    %c0_i32_0 = arith.constant 0 : i32
    %c0_i32_1 = arith.constant 0 : i32
    return %arg0, %c0_i32, %c0_i32_0 : i32, i32, i32
  }
  func.func @transform_3(%arg0: i32) -> (i32, i32, i32) {
    %c0_i32 = arith.constant 0 : i32
    %c0_i32_0 = arith.constant 0 : i32
    %c0_i32_1 = arith.constant 0 : i32
    return %arg0, %c0_i32, %c0_i32_0 : i32, i32, i32
  }
  func.func @transform_4(%arg0: i32) -> (i32, i32) {
    %c0_i32 = arith.constant 0 : i32
    %c0_i32_0 = arith.constant 0 : i32
    %c0_i32_1 = arith.constant 0 : i32
    return %c0_i32, %c0_i32_0 : i32, i32
  }
  func.func @transform_5(%arg0: i32) -> (i32, i32) {
    %c0_i32 = arith.constant 0 : i32
    %c0_i32_0 = arith.constant 0 : i32
    %c0_i32_1 = arith.constant 0 : i32
    return %c0_i32, %c0_i32_0 : i32, i32
  }
  func.func @transform_6(%arg0: i32) -> (i32, i32, i32) {
    %c0_i32 = arith.constant 0 : i32
    %c0_i32_0 = arith.constant 0 : i32
    %c0_i32_1 = arith.constant 0 : i32
    %c0_i32_2 = arith.constant 0 : i32
    return %c0_i32, %c0_i32_0, %c0_i32_1 : i32, i32, i32
  }
  func.func @transform_7(%arg0: i32) -> (i32, i32, i32) {
    %c0_i32 = arith.constant 0 : i32
    %c0_i32_0 = arith.constant 0 : i32
    %c0_i32_1 = arith.constant 0 : i32
    %c0_i32_2 = arith.constant 0 : i32
    return %c0_i32, %c0_i32_0, %c0_i32_1 : i32, i32, i32
  }
  func.func @transform_8(%arg0: i32) -> (i32, i32, i32) {
    %c0_i32 = arith.constant 0 : i32
    %c0_i32_0 = arith.constant 0 : i32
    %c0_i32_1 = arith.constant 0 : i32
    %c0_i32_2 = arith.constant 0 : i32
    return %c0_i32, %c0_i32_0, %c0_i32_1 : i32, i32, i32
  }
  func.func @transform_9(%arg0: i32) -> (i32, i32, i32) {
    %c0_i32 = arith.constant 0 : i32
    %c0_i32_0 = arith.constant 0 : i32
    %c0_i32_1 = arith.constant 0 : i32
    %c0_i32_2 = arith.constant 0 : i32
    return %c0_i32, %c0_i32_0, %c0_i32_1 : i32, i32, i32
  }
  func.func @transform_10(%arg0: i32) -> (i32, i32, i32) {
    %c0_i32 = arith.constant 0 : i32
    %c0_i32_0 = arith.constant 0 : i32
    %c0_i32_1 = arith.constant 0 : i32
    %c0_i32_2 = arith.constant 0 : i32
    return %c0_i32, %c0_i32_0, %c0_i32_1 : i32, i32, i32
  }
  func.func @transform_11(%arg0: i32) -> (i32, i32, i32) {
    %c0_i32 = arith.constant 0 : i32
    %c0_i32_0 = arith.constant 0 : i32
    %c0_i32_1 = arith.constant 0 : i32
    %c0_i32_2 = arith.constant 0 : i32
    return %c0_i32, %c0_i32_0, %c0_i32_1 : i32, i32, i32
  }
  func.func @transform_12(%arg0: i32) -> (i32, i32, i32) {
    %c0_i32 = arith.constant 0 : i32
    %c0_i32_0 = arith.constant 0 : i32
    %c0_i32_1 = arith.constant 0 : i32
    %c0_i32_2 = arith.constant 0 : i32
    return %c0_i32, %c0_i32_0, %c0_i32_1 : i32, i32, i32
  }
  func.func @transform_13(%arg0: i32) -> (i32, i32, i32) {
    %c0_i32 = arith.constant 0 : i32
    %c0_i32_0 = arith.constant 0 : i32
    %c0_i32_1 = arith.constant 0 : i32
    %c0_i32_2 = arith.constant 0 : i32
    return %c0_i32, %c0_i32_0, %c0_i32_1 : i32, i32, i32
  }
  func.func @transform_14(%arg0: i32) -> (i32, i32, i32) {
    %c0_i32 = arith.constant 0 : i32
    %c0_i32_0 = arith.constant 0 : i32
    %c0_i32_1 = arith.constant 0 : i32
    %c0_i32_2 = arith.constant 0 : i32
    return %c0_i32, %c0_i32_0, %c0_i32_1 : i32, i32, i32
  }
  func.func @transform_15(%arg0: i32) -> (i32, i32, i32) {
    %c0_i32 = arith.constant 0 : i32
    %c0_i32_0 = arith.constant 0 : i32
    %c0_i32_1 = arith.constant 0 : i32
    %c0_i32_2 = arith.constant 0 : i32
    return %c0_i32, %c0_i32_0, %c0_i32_1 : i32, i32, i32
  }
  func.func @transform_16(%arg0: i32) -> (i32, i32, i32) {
    %c0_i32 = arith.constant 0 : i32
    %c0_i32_0 = arith.constant 0 : i32
    %c0_i32_1 = arith.constant 0 : i32
    %c0_i32_2 = arith.constant 0 : i32
    return %c0_i32, %c0_i32_0, %c0_i32_1 : i32, i32, i32
  }
  func.func @transform_17(%arg0: i32) -> (i32, i32, i32) {
    %c0_i32 = arith.constant 0 : i32
    %c0_i32_0 = arith.constant 0 : i32
    %c0_i32_1 = arith.constant 0 : i32
    %c0_i32_2 = arith.constant 0 : i32
    return %c0_i32, %c0_i32_0, %c0_i32_1 : i32, i32, i32
  }
  func.func @transform_18(%arg0: i32) -> (i32, i32) {
    %c0_i32 = arith.constant 0 : i32
    %c0_i32_0 = arith.constant 0 : i32
    %c0_i32_1 = arith.constant 0 : i32
    return %c0_i32, %c0_i32_0 : i32, i32
  }
  func.func @transform_19(%arg0: i32) -> (i32, i32) {
    %c0_i32 = arith.constant 0 : i32
    %c0_i32_0 = arith.constant 0 : i32
    %c0_i32_1 = arith.constant 0 : i32
    return %c0_i32, %c0_i32_0 : i32, i32
  }
  func.func @transform_20(%arg0: i32) -> (i32, i32) {
    %c0_i32 = arith.constant 0 : i32
    %c0_i32_0 = arith.constant 0 : i32
    %c0_i32_1 = arith.constant 0 : i32
    return %c0_i32, %c0_i32_0 : i32, i32
  }
  func.func @transform_21(%arg0: i32) -> (i32, i32) {
    %c0_i32 = arith.constant 0 : i32
    %c0_i32_0 = arith.constant 0 : i32
    %c0_i32_1 = arith.constant 0 : i32
    return %c0_i32, %c0_i32_0 : i32, i32
  }
  func.func @transform_22(%arg0: i32) -> (i32, i32, i32) {
    %c0_i32 = arith.constant 0 : i32
    %c0_i32_0 = arith.constant 0 : i32
    %c0_i32_1 = arith.constant 0 : i32
    return %arg0, %c0_i32, %c0_i32_0 : i32, i32, i32
  }
}

</mosaic_0001>

<bundles_post_ra>
// kernel: bert_cross_forward.1
= control target key start
LH: loop header
LB: loop body
LE: loop exit
PB: predicated region body
PF: predicated region fallthrough
CT: control target
= control target key end

     0   :  { %s3911_s0 = inlined_call_operand.vmem [shape: f32[2,8,32], index: 0, kind: input, shape index: {}]   ;;  %s3912_s1 = inlined_call_operand.vmem [shape: f32[8,32], index: 1, kind: input, shape index: {}]   ;;  %s3913_s2 = inlined_call_operand.vmem [shape: f32[2,8,32], index: 2, kind: input, shape index: {}]   ;;  %s3914_s3 = inlined_call_operand.vmem [shape: f32[2,1,8], index: 3, kind: input, shape index: {}]   ;;  %s3915_s4 = inlined_call_operand.vmem [shape: f32[1,32], index: 4, kind: input, shape index: {}]   ;;  %s3916_s5 = inlined_call_operand.vmem [shape: f32[1,32], index: 5, kind: input, shape index: {}]   ;;  %s3917_s6 = inlined_call_operand.vmem [shape: f32[2,32,96], index: 6, kind: input, shape index: {}]   ;;  %s3918_s7 = inlined_call_operand.vmem [shape: f32[2,1,96], index: 7, kind: input, shape index: {}]   ;;  %s3919_s8 = inlined_call_operand.vmem [shape: f32[2,32,32], index: 8, kind: input, shape index: {}]   ;;  %s3920_s9 = inlined_call_operand.vmem [shape: f32[2,1,32], index: 9, kind: input, shape index: {}]   ;;  %s3921_s10 = inlined_call_operand.vmem [shape: f32[2,1,32], index: 10, kind: input, shape index: {}]   ;;  %s3922_s11 = inlined_call_operand.vmem [shape: f32[2,1,32], index: 11, kind: input, shape index: {}]   ;;  %s3923_s12 = inlined_call_operand.vmem [shape: f32[2,32,128], index: 12, kind: input, shape index: {}]   ;;  %s3924_s13 = inlined_call_operand.vmem [shape: f32[2,1,128], index: 13, kind: input, shape index: {}]   ;;  %s3925_s14 = inlined_call_operand.vmem [shape: f32[2,128,32], index: 14, kind: input, shape index: {}]   ;;  %s3926_s15 = inlined_call_operand.vmem [shape: f32[2,1,32], index: 15, kind: input, shape index: {}]   ;;  %s3927_s16 = inlined_call_operand.vmem [shape: f32[2,1,32], index: 16, kind: input, shape index: {}]   ;;  %s3928_s17 = inlined_call_operand.vmem [shape: f32[2,1,32], index: 17, kind: input, shape index: {}]   ;;  %s3929_s18 = inlined_call_operand.vmem [shape: f32[32,32], index: 18, kind: input, shape index: {}]   ;;  %s3930_s19 = inlined_call_operand.vmem [shape: f32[1,32], index: 19, kind: input, shape index: {}]   ;;  %s3931_s20 = inlined_call_operand.vmem [shape: f32[32,128], index: 20, kind: input, shape index: {}]   ;;  %s3932_s21 = inlined_call_operand.vmem [shape: f32[1,128], index: 21, kind: input, shape index: {}]   ;;  %s3933_s22 = inlined_call_operand.hbm [shape: f32[2,1,128], index: 22, kind: output, shape index: {}]  }
   0x1   :  { %3944 = sst [smem:[#allocation11_spill]] %s3911_s0 }
   0x2   :  { %3945 = sst [smem:[#allocation12_spill]] %s3912_s1 }
   0x3   :  { %3946 = sst [smem:[#allocation13_spill]] %s3913_s2 }
   0x4   :  { %3947 = sst [smem:[#allocation14_spill]] %s3914_s3 }
   0x5   :  { %3948 = sst [smem:[#allocation15_spill]] %s3915_s4 }
   0x6   :  { %3949 = sst [smem:[#allocation16_spill]] %s3916_s5 }
   0x7   :  { %3950 = sst [smem:[#allocation17_spill]] %s3917_s6 }
   0x8   :  { %3951 = sst [smem:[#allocation18_spill]] %s3933_s22 }
   0x9   :  { %27 = vsyncpa [#allocation3], 0 }
   0xa   :  { %29 = vsyncpa [#allocation3 + $0x1], 0  ;;  %s3402_s3 = smov 0   ;;  %s3404_s28 = smov 0  }
   0xb   :  { %s3406_s29 = smov 0   ;;  %s3408_s30 = smov 0  }
   0xc LB: > { %3952 = sst [smem:[#allocation5_spill]] %s3264_s3  ;;  %s3423_s4 = sadd.s32 4294967295, %s3276_s30   ;;  %s3276_s30 = sphi %s3408_s30, %s3973_s30   ;;  %s3272_s29 = sphi %s3406_s29, %s3975_s29   ;;  %s3268_s28 = sphi %s3404_s28, %s3977_s28   ;;  %s3264_s3 = sphi %s3402_s3, %s3976_s3  }
   0xd   : > { %3953 = sst [smem:[#allocation6_spill]] %s3272_s29  ;;  %s2657_s0 = sadd.s32 4294967294, %s3276_s30  }
   0xe   : > { %3954 = sst [smem:[#allocation7_spill]] %s3276_s30  ;;  %s3427_s23 = sadd.s32 1, %s3276_s30  }
   0xf   : > { %3955 = sst [smem:[#allocation8_spill]] %s3427_s23  ;;  %s519_s1 = sadd.s32 1, %s3272_s29 }
  0x10   : > { %s516_s5 = ssub.s32 %s3276_s30, %s3427_s23  ;;  %p529_p0 = scmp.ne.s32.totalorder %s3272_s29, %s3268_s28 }
  0x11   : > { %p517_p1 = scmp.eq.s32.totalorder %s516_s5, 0  ;;  %p530_p2 = scmp.eq.s32.totalorder %s3423_s4, 1 }
  0x12   : > { %p535_p3 = scmp.ne.s32.totalorder %s3268_s28, %s3264_s3  ;;  %p536_p4 = scmp.eq.s32.totalorder %s2657_s0, 1 }
  0x13   : > { %s3438_s24 = scalar_select %p517_p1, %s3272_s29, %s519_s1  }
  0x14   : > { %p3440_p5 = por %p530_p2, %p529_p0  ;;  %p3444_p6 = por %p536_p4, %p535_p3 }
  0x15   : > { %3956 = sst [smem:[#allocation9_spill]] %s3438_s24  ;;  %p2660_p7 = scmp.ge.s32.totalorder %s3276_s30, 1 }
  0x16   : > { %s3958_s25 = scalar_select %p3444_p6, 1, 0 }
  0x17   : > { %p631_p8 = scmp.lt.s32.totalorder %s3276_s30, 3 }
  0x18   : > { %3959 = sst [smem:[#allocation10_spill]] %s3958_s25 }
  0x19   : > { %p632_p9 = pnand %p2660_p7, %p631_p8 }
  0x1a   : > { %p698_p10 = scmp.lt.s32.totalorder (!%p632_p9), %s3423_s4, 1  ;;  %s3960_s1 = sld [smem:[#allocation12_spill]] (!%p632_p9)  ;;  %vm716_vm0 = vcmask (!%p632_p9), 261120   ;;  %v3278_v14 = vmov (!%p632_p9), 0.0|0.0   ;;  %vm3279_vm1 = vmmov (!%p632_p9), 0   ;;  %v3280_v17 = vmov (!%p632_p9), 0.0  }
  0x1b   : > { %635 = sbr.rel (%p632_p9) target bundleno = 6831 (0x1aaf), region = 108  ;;  %s3961_s29 = sld [smem:[#allocation11_spill]] (!%p632_p9)  ;;  %3039 = vmatprep.subr.bf16.mxu0 (!%p632_p9), %v3278_v14  ;;  %2843 = vmatprep.mubr.msk.f32.mxu0 (!%p632_p9), %vm3279_vm1, %v3280_v17  ;;  %v2665_v28 = vld [vmem:[%s3918_s7] ss:$0 sm:$0xff] (!%p632_p9)  ;;  %vm838_vm2 = vcmask (!%p632_p9), 130048   ;;  %vm921_vm3 = vcmask (!%p632_p9), 64512  }
  0x1c   : > { %s3962_s30 = sld [smem:[#allocation13_spill]] (!%p632_p9)  ;;  %s3963_s27 = sld [smem:[#allocation17_spill]] (!%p632_p9)  ;;  %2851 = vmatprep.subr.mxu1 (!%p632_p9), %v3280_v17  ;;  %2853 = vmatprep.mubr.msk.f32.mxu1 (!%p632_p9), %vm3279_vm1, %v3280_v17  ;;  %v830_v45 = vld [vmem:[%s3919_s8] sm:$0xff] (!%p632_p9)  ;;  %v831_v46 = vld [vmem:[%s3919_s8 + $0x8] sm:$0xff] (!%p632_p9) }
  0x1d   : > { %s3964_s5 = sld [smem:[#allocation15_spill]] (!%p632_p9)  ;;  %s3965_s3 = sld [smem:[#allocation16_spill]] (!%p632_p9)  ;;  %v3046_v47 = vpack.c.bf16 (!%p632_p9), %v831_v46, %v830_v45  ;;  %v1455_v45 = vld [vmem:[%s3925_s14 + $0x10] sm:$0xff] (!%p632_p9)  ;;  %v1456_v46 = vld [vmem:[%s3925_s14 + $0x18] sm:$0xff] (!%p632_p9) }
  0x1e   : > { %s3282_s25 = smov (!%p632_p9), 96   ;;  %s3942_s0 = smov (!%p632_p9), 48  }
  0x20   : > { %v710_v0 = vld [vmem:[%s3960_s1] sm:$0xff] (!%p632_p9) }
  0x22   : > { %s3452_s26 = scalar_select %p698_p10, %s3423_s4, 1  ;;  %v746_v11 = vld [vmem:[%s3963_s27] sm:$0xff]  ;;  %v747_v12 = vld [vmem:[%s3963_s27 + $0x8] sm:$0xff]  ;;  %v748_v13 = vld [vmem:[%s3963_s27 + $0x10] sm:$0xff] }
  0x23   : > { %v3040_v15 = vpack.c.bf16 %v747_v12, %v746_v11  ;;  %v749_v16 = vld [vmem:[%s3963_s27 + $0x18] sm:$0xff]  ;;  %v2663_v23 = vld [vmem:[%s3964_s5] ss:$0 sm:$0xff]  ;;  %s3966_s5 = sld [smem:[#allocation14_spill]] }
  0x24   : > { %s2661_s2 = sshll.u32 %s3452_s26, 3  ;;  %v3043_v18 = vpack.c.bf16 %v749_v16, %v748_v13  ;;  %v2664_v25 = vld [vmem:[%s3965_s3] ss:$0 sm:$0xff] }
  0x25   : > { %s701_s23 = scalar_lea.vmem %s3961_s29, %s2661_s2  ;;  %s705_s22 = scalar_lea.vmem %s3962_s30, %s2661_s2  ;;  %3041 = vmatpush3.bf16.msra.mxu0 %v3040_v15  ;;  %v2672_v12 = vld [vmem:[%s3920_s9] ss:$0 sm:$0xff] }
  0x26   : > { %v709_v1 = vld [vmem:[%s701_s23] sm:$0xff]  ;;  %3042 = vmatprep.subr.bf16.mxu0 %v3278_v14  ;;  %s3943_s23 = smov 64   ;;  %s3283_s2 = smov 80  }
  0x27   : > { %v712_v2 = vld [vmem:[%s705_s22] sm:$0xff]  ;;  %v711_v3 = vadd.f32 %v710_v0, %v709_v1  ;;  %s696_s22 = sand.u32 1, %s3268_s28  }
  0x28   : > { %s2569_s3 = scalar_lea.sflag [#allocation3], %s696_s22 }
  0x29   : > { %v713_v4 = vadd.f32 %v712_v2, %v711_v3  ;;  %3044 = vmatpush3.bf16.msra.mxu0 %v3043_v18  ;;  %s708_s29 = scalar_lea.vmem %s3966_s5, %s3452_s26  ;;  %s3284_s26 = smov 112   ;;  %v832_v2 = vld [vmem:[%s3919_s8 + $0x10] sm:$0xff]  ;;  %v833_v3 = vld [vmem:[%s3919_s8 + $0x18] sm:$0xff] }
  0x2a   : > { %2846 = vmatprep.subr.mxu0 %v3280_v17  ;;  %v3514_v35 = vld [vmem:[%s708_s29] ss:$0 sm:$0xff]  ;;  %s3968_s29 = smov 48  }
  0x2b   : > { %v717_v5 = vsel %vm716_vm0, %v713_v4, 0.0 }
  0x2c   : > { %718 = vadd.xlane.f32.xlu0 %v717_v5 }
  0xb9   : > { %v719_v6 = vpop.xlane.xlu0 %718 }
  0xba   : > { %v721_v7 = vmul.f32 0.03125, %v719_v6 }
  0xbc   : > { %v722_v8 = vsub.f32 %v713_v4, %v721_v7  ;;  %v3049_v4 = vpack.c.bf16 %v833_v3, %v832_v2  ;;  %v2679_v2 = vld [vmem:[%s3924_s13] ss:$0 sm:$0xff] }
  0xbe   : > { %v723_v9 = vmul.f32 %v722_v8, %v722_v8 }
  0xc0   : > { %v724_v10 = vsel %vm716_vm0, %v723_v9, 0.0 }
  0xc1   : > { %725 = vadd.xlane.f32.xlu0 %v724_v10 }
 0x14e   : > { %v726_v19 = vpop.xlane.xlu0 %725 }
 0x14f   : > { %v727_v20 = vmul.f32 0.03125, %v726_v19 }
 0x151   : > { %v728_v21 = vadd.f32 1e-12, %v727_v20 }
 0x153   : > { %3182 = vrsqrt.f32 %v728_v21 }
 0x15d   : > { %v3183_v22 = vpop.eup %3182 }
 0x15e   : > { %v730_v24 = vmul.f32 %v3183_v22, %v722_v8 }
 0x160   : > { %v737_v26 = vmul.f32 %v2663_v23, %v730_v24 }
 0x162   : > { %v3492_v27 = vadd.f32 %v2664_v25, %v737_v26  ;;  %v1360_v26 = vld [vmem:[%s3923_s12] sm:$0xff] }
 0x164   : > { %2844 = vmatmul.mubr.msk.f32.vlgmr.msra.gmra.mrb[0].mxu0 %vm716_vm0, %v3492_v27 }
 0x165   : > { %2848 = vmatprep.mubr.msk.f32.mxu0 %vm3279_vm1, %v3280_v17 }
 0x237   : > { %v826_v29 = vpop.f32.mrb[0].mxu0 }
 0x238   : > { %v827_v30 = vadd.f32 %v2665_v28, %v826_v29  ;;  %v2845_v31 = vpop.f32.mrb[1].mxu0  ;;  %v1361_v28 = vld [vmem:[%s3923_s12 + $0x8] sm:$0xff] }
 0x239   : > { %v3052_v29 = vpack.c.bf16 %v1361_v28, %v1360_v26 }
 0x23a   : > { %933 = vrot.lane.b32.xlu0 %v827_v30, %s3943_s23  ;;  %836 = vrot.lane.b32.xlu1 %v827_v30, %s3282_s25 }
 0x23e   : > { %1091 = vrot.lane.b32.xlu0 %v827_v30, %s3283_s2 }
 0x2ac   : > { %v934_v32 = vpop.permute.xlu0 %933  ;;  %v837_v33 = vpop.permute.xlu1 %836 }
 0x2ad   : > { %2847 = vmatpush3.xpose.msk.msra.mxu0 %vm838_vm2, %v837_v33  ;;  %2852 = vmatpush3.msra.mxu1 %v934_v32  ;;  %v1453_v32 = vld [vmem:[%s3925_s14] sm:$0xff]  ;;  %v1454_v33 = vld [vmem:[%s3925_s14 + $0x8] sm:$0xff] }
 0x2ae   : > { %2863 = vmatprep.subr.mxu1 %v3280_v17  ;;  %3045 = vmatprep.subr.bf16.mxu0 %v3278_v14 }
 0x2b0   : > { %2849 = vmatmul.mubr.msk.f32.vlgmr.msra.gmra.mrb[2].mxu0 %vm838_vm2, %v827_v30  ;;  %v1092_v48 = vpop.permute.xlu0 %1091 }
 0x2b1   : > { %2860 = vmatprep.mubr.msk.f32.mxu0 %vm3279_vm1, %v3280_v17  ;;  %3047 = vmatpush3.bf16.msra.mxu0 %v3046_v47  ;;  %v3061_v47 = vpack.c.bf16 %v1456_v46, %v1455_v45 }
 0x2b2   : > { %2868 = vmatprep.subr.mxu0 %v3280_v17 }
 0x383   : > { %v909_v34 = vpop.f32.mrb[2].mxu0 }
 0x384   : > { %v913_v36 = vmul.f32 0.25, %v909_v34  ;;  %v2850_v37 = vpop.f32.mrb[3].mxu0  ;;  %v3058_v34 = vpack.c.bf16 %v1454_v33, %v1453_v32  ;;  %v2687_v32 = vld [vmem:[%s3963_s27 + $0x38] sm:$0xff] }
 0x386   : > { %v920_v38 = vadd.f32 %v3514_v35, %v913_v36 }
 0x388   : > { %v922_v39 = vsel %vm921_vm3, %v920_v38, -inf }
 0x389   : > { %923 = vmax.xlane.f32.xlu1 %v922_v39 }
 0x416   : > { %v924_v40 = vpop.xlane.xlu1 %923 }
 0x417   : > { %v925_v41 = vsub.f32 %v920_v38, %v924_v40  ;;  %v2677_v40 = vld [vmem:[%s3921_s10] ss:$0 sm:$0xff] }
 0x419   : > { %v926_v42 = vmul.f32 1.442695, %v925_v41 }
 0x41b   : > { %3184 = vpow2.f32 %v926_v42  ;;  %v2678_v42 = vld [vmem:[%s3922_s11] ss:$0 sm:$0xff] }
 0x425   : > { %v3185_v43 = vpop.eup %3184 }
 0x426   : > { %v928_v44 = vsel %vm921_vm3, %v3185_v43, 0.0 }
 0x427   : > { %929 = vadd.xlane.f32.xlu0 %v928_v44 }
 0x43d   : > { %1089 = vrot.lane.b32.xlu0 %v827_v30, %s3284_s26 }
 0x4b4   : > { %v930_v49 = vpop.xlane.xlu0 %929 }
 0x4b5   : > { %3186 = vrcp.f32 %v930_v49  ;;  %v1458_v49 = vld [vmem:[%s3925_s14 + $0x28] sm:$0xff] }
 0x4b8   : > { %v1090_v52 = vpop.permute.xlu0 %1089 }
 0x4bf   : > { %v3187_v50 = vpop.eup %3186 }
 0x4c0   : > { %v932_v51 = vmul.f32 %v3187_v50, %v3185_v43 }
 0x4c2   : > { %2854 = vmatmul.mubr.msk.f32.vlgmr.msra.gmra.mrb[0].mxu1 %vm921_vm3, %v932_v51  ;;  %v1459_v51 = vld [vmem:[%s3925_s14 + $0x30] sm:$0xff] }
 0x4c3   : > { %2864 = vmatpush3.xpose.msk.msra.mxu1 %vm838_vm2, %v1092_v48  ;;  %2865 = vmatprep.mubr.msk.f32.mxu1 %vm3279_vm1, %v3280_v17  ;;  %v1457_v48 = vld [vmem:[%s3925_s14 + $0x20] sm:$0xff] }
 0x4c4   : > { %3048 = vmatprep.subr.bf16.mxu1 %v3278_v14  ;;  %v3064_v50 = vpack.c.bf16 %v1458_v49, %v1457_v48 }
 0x4c6   : > { %2866 = vmatmul.mubr.msk.f32.vlgmr.msra.gmra.mrb[2].mxu1 %vm838_vm2, %v1090_v52  ;;  %v1460_v52 = vld [vmem:[%s3925_s14 + $0x38] sm:$0xff] }
 0x4c7   : > { %2877 = vmatprep.mubr.msk.f32.mxu1 %vm3279_vm1, %v3280_v17  ;;  %3050 = vmatpush3.bf16.msra.mxu1 %v3049_v4 }
 0x4c8   : > { %3057 = vmatprep.subr.bf16.mxu1 %v3278_v14 }
 0x595   : > { %v1005_v53 = vpop.f32.mrb[0].mxu1 }
 0x596   : > { %v2855_v54 = vpop.f32.mrb[1].mxu1  ;;  %2861 = vmatmul.mubr.msk.f32.vlgmr.msra.gmra.mrb[4].mxu0 %vm838_vm2, %v1005_v53  ;;  %v3067_v53 = vpack.c.bf16 %v1460_v52, %v1459_v51 }
 0x597   : > { %2870 = vmatprep.mubr.msk.f32.mxu0 %vm3279_vm1, %v3280_v17  ;;  %v1461_v54 = vld [vmem:[%s3925_s14 + $0x40] sm:$0xff] }
 0x599   : > { %v1163_v55 = vpop.f32.mrb[2].mxu1 }
 0x59a   : > { %v1167_v56 = vmul.f32 0.25, %v1163_v55  ;;  %v2867_v57 = vpop.f32.mrb[3].mxu1  ;;  %v1462_v55 = vld [vmem:[%s3925_s14 + $0x48] sm:$0xff] }
 0x59b   : > { %v1463_v57 = vld [vmem:[%s3925_s14 + $0x50] sm:$0xff] }
 0x59c   : > { %v1168_v58 = vadd.f32 %v3514_v35, %v1167_v56  ;;  %v3070_v56 = vpack.c.bf16 %v1462_v55, %v1461_v54 }
 0x59e   : > { %v1169_v59 = vsel %vm921_vm3, %v1168_v58, -inf }
 0x59f   : > { %1170 = vmax.xlane.f32.xlu1 %v1169_v59 }
 0x5b0   : > { %1180 = vrot.lane.b32.xlu1 %v827_v30, %s3942_s0  ;;  %v1363_v30 = vld [vmem:[%s3923_s12 + $0x18] sm:$0xff]  ;;  %s3969_s0 = sld [smem:[#allocation18_spill]] }
 0x62c   : > { %v1171_v60 = vpop.xlane.xlu1 %1170 }
 0x62d   : > { %v1172_v61 = vsub.f32 %v1168_v58, %v1171_v60  ;;  %v1464_v58 = vld [vmem:[%s3925_s14 + $0x58] sm:$0xff]  ;;  %v1465_v60 = vld [vmem:[%s3925_s14 + $0x60] sm:$0xff] }
 0x62e   : > { %v3073_v59 = vpack.c.bf16 %v1464_v58, %v1463_v57 }
 0x62f   : > { %v1173_v62 = vmul.f32 1.442695, %v1172_v61  ;;  %v1466_v61 = vld [vmem:[%s3925_s14 + $0x68] sm:$0xff] }
 0x630   : > { %v1181_v63 = vpop.permute.xlu1 %1180 }
 0x631   : > { %3188 = vpow2.f32 %v1173_v62  ;;  %2869 = vmatpush3.msra.mxu0 %v1181_v63  ;;  %v3076_v62 = vpack.c.bf16 %v1466_v61, %v1465_v60  ;;  %v1467_v63 = vld [vmem:[%s3925_s14 + $0x70] sm:$0xff]  ;;  %v2691_v61 = vld [vmem:[%s3919_s8 + $0x20] sm:$0xff] }
 0x632   : > { %3051 = vmatprep.subr.bf16.mxu0 %v3278_v14 }
 0x63b   : > { %v3189_v0 = vpop.eup %3188 }
 0x63c   : > { %v1175_v1 = vsel %vm921_vm3, %v3189_v0, 0.0 }
 0x63d   : > { %1176 = vadd.xlane.f32.xlu0 %v1175_v1 }
 0x669   : > { %v1078_v5 = vpop.f32.mrb[4].mxu0 }
 0x66a   : > { %v2862_v6 = vpop.f32.mrb[5].mxu0  ;;  %v1088_v13 = vadd.f32 %v2672_v12, %v1078_v5 }
 0x6ca   : > { %v1177_v7 = vpop.xlane.xlu0 %1176 }
 0x6cb   : > { %3190 = vrcp.f32 %v1177_v7 }
 0x6d5   : > { %v3191_v8 = vpop.eup %3190 }
 0x6d6   : > { %v1179_v9 = vmul.f32 %v3191_v8, %v3189_v0  ;;  %v1468_v0 = vld [vmem:[%s3925_s14 + $0x78] sm:$0xff] }
 0x6d7   : > { %v3079_v1 = vpack.c.bf16 %v1468_v0, %v1467_v63 }
 0x6d8   : > { %2871 = vmatmul.mubr.msk.f32.vlgmr.msra.gmra.mrb[6].mxu0 %vm921_vm3, %v1179_v9 }
 0x6d9   : > { %2888 = vmatprep.mubr.msk.f32.mxu0 %vm3279_vm1, %v3280_v17  ;;  %3053 = vmatpush3.bf16.msra.mxu0 %v3052_v29  ;;  %v2684_v29 = vld [vmem:[%s3963_s27 + $0x20] sm:$0xff] }
 0x6da   : > { %3054 = vmatprep.subr.bf16.mxu0 %v3278_v14 }
 0x7ab   : > { %v1252_v10 = vpop.f32.mrb[6].mxu0 }
 0x7ac   : > { %v2872_v11 = vpop.f32.mrb[7].mxu0  ;;  %2878 = vmatmul.mubr.msk.f32.vlgmr.msra.gmra.mrb[4].mxu1 %vm838_vm2, %v1252_v10 }
 0x7ad   : > { %2923 = vmatprep.mubr.msk.f32.mxu1 %vm3279_vm1, %v3280_v17  ;;  %3059 = vmatpush3.bf16.msra.mxu1 %v3058_v34 }
 0x7ae   : > { %3060 = vmatprep.subr.bf16.mxu1 %v3278_v14 }
 0x7b1   : > { %3062 = vmatpush3.bf16.msra.mxu1 %v3061_v47 }
 0x7b2   : > { %3063 = vmatprep.subr.bf16.mxu1 %v3278_v14 }
 0x7b5   : > { %3065 = vmatpush3.bf16.msra.mxu1 %v3064_v50 }
 0x7b6   : > { %3066 = vmatprep.subr.bf16.mxu1 %v3278_v14 }
 0x7b9   : > { %3068 = vmatpush3.bf16.msra.mxu1 %v3067_v53 }
 0x7ba   : > { %3069 = vmatprep.subr.bf16.mxu1 %v3278_v14 }
 0x7bd   : > { %3071 = vmatpush3.bf16.msra.mxu1 %v3070_v56 }
 0x7be   : > { %3072 = vmatprep.subr.bf16.mxu1 %v3278_v14 }
 0x7c1   : > { %3074 = vmatpush3.bf16.msra.mxu1 %v3073_v59 }
 0x7c2   : > { %3075 = vmatprep.subr.bf16.mxu1 %v3278_v14 }
 0x7c5   : > { %3077 = vmatpush3.bf16.msra.mxu1 %v3076_v62  ;;  %v2692_v62 = vld [vmem:[%s3919_s8 + $0x28] sm:$0xff] }
 0x7c6   : > { %3078 = vmatprep.subr.bf16.mxu1 %v3278_v14  ;;  %v3088_v0 = vpack.c.bf16 %v2692_v62, %v2691_v61  ;;  %v2720_v62 = vld [vmem:[%s3925_s14 + $0xa0] sm:$0xff] }
 0x7c9   : > { %3080 = vmatpush3.bf16.msra.mxu1 %v3079_v1 }
 0x7ca   : > { %3090 = vmatprep.subr.bf16.mxu1 %v3278_v14 }
 0x87f   : > { %v1325_v15 = vpop.f32.mrb[4].mxu1 }
 0x880   : > { %v1329_v16 = vadd.f32 %v1325_v15, %v1088_v13  ;;  %v2879_v18 = vpop.f32.mrb[5].mxu1 }
 0x882   : > { %v1330_v19 = vadd.f32 %v1329_v16, %v3492_v27  ;;  %v1362_v27 = vld [vmem:[%s3923_s12 + $0x10] sm:$0xff]  ;;  %v2681_v16 = vld [vmem:[%s3926_s15] ss:$0 sm:$0xff] }
 0x883   : > { %v3055_v31 = vpack.c.bf16 %v1363_v30, %v1362_v27  ;;  %v2685_v27 = vld [vmem:[%s3963_s27 + $0x28] sm:$0xff] }
 0x884   : > { %v1333_v20 = vsel %vm716_vm0, %v1330_v19, 0.0  ;;  %v3082_v30 = vpack.c.bf16 %v2685_v27, %v2684_v29  ;;  %v2700_v29 = vld [vmem:[%s3920_s9 + $0x1] ss:$0 sm:$0xff] }
 0x885   : > { %1334 = vadd.xlane.f32.xlu1 %v1333_v20  ;;  %3056 = vmatpush3.bf16.msra.mxu0 %v3055_v31  ;;  %v2686_v31 = vld [vmem:[%s3963_s27 + $0x30] sm:$0xff] }
 0x886   : > { %3081 = vmatprep.subr.bf16.mxu0 %v3278_v14  ;;  %v3085_v33 = vpack.c.bf16 %v2687_v32, %v2686_v31 }
 0x912   : > { %v1335_v21 = vpop.xlane.xlu1 %1334 }
 0x913   : > { %v1336_v22 = vmul.f32 0.03125, %v1335_v21 }
 0x915   : > { %v1337_v23 = vsub.f32 %v1330_v19, %v1336_v22 }
 0x917   : > { %v1338_v24 = vmul.f32 %v1337_v23, %v1337_v23 }
 0x919   : > { %v1339_v25 = vsel %vm716_vm0, %v1338_v24, 0.0 }
 0x91a   : > { %1340 = vadd.xlane.f32.xlu0 %v1339_v25 }
 0x9a7   : > { %v1341_v36 = vpop.xlane.xlu0 %1340 }
 0x9a8   : > { %v1342_v37 = vmul.f32 0.03125, %v1341_v36 }
 0x9aa   : > { %v1343_v38 = vadd.f32 1e-12, %v1342_v37 }
 0x9ac   : > { %3192 = vrsqrt.f32 %v1343_v38 }
 0x9b6   : > { %v3193_v39 = vpop.eup %3192 }
 0x9b7   : > { %v1345_v41 = vmul.f32 %v3193_v39, %v1337_v23  ;;  %v2682_v39 = vld [vmem:[%s3927_s16] ss:$0 sm:$0xff] }
 0x9b9   : > { %v1352_v43 = vmul.f32 %v2677_v40, %v1345_v41  ;;  %v2683_v41 = vld [vmem:[%s3928_s17] ss:$0 sm:$0xff] }
 0x9bb   : > { %v1359_v44 = vadd.f32 %v2678_v42, %v1352_v43 }
 0x9bd   : > { %2889 = vmatmul.mubr.msk.f32.vlgmr.msra.gmra.mrb[8].mxu0 %vm716_vm0, %v1359_v44 }
 0x9be   : > { %2934 = vmatprep.mubr.msk.f32.mxu0 %vm3279_vm1, %v3280_v17  ;;  %3083 = vmatpush3.bf16.msra.mxu0 %v3082_v30 }
 0x9bf   : > { %3084 = vmatprep.subr.bf16.mxu0 %v3278_v14 }
 0x9c2   : > { %3086 = vmatpush3.bf16.msra.mxu0 %v3085_v33 }
 0x9c3   : > { %2937 = vmatprep.subr.mxu0 %v3280_v17 }
 0xa90   : > { %v1440_v3 = vpop.f32.mrb[8].mxu0 }
 0xa91   : > { %v1441_v4 = vadd.f32 %v2679_v2, %v1440_v3  ;;  %v2890_v5 = vpop.f32.mrb[9].mxu0 }
 0xa93   : > { %v1445_v6 = vmul.f32 0.044715, %v1441_v4  ;;  %v1444_v12 = vmul.f32 0.5, %v1441_v4 }
 0xa95   : > { %v1446_v7 = vmul.f32 %v1445_v6, %v1441_v4 }
 0xa97   : > { %v1447_v8 = vmul.f32 %v1446_v7, %v1441_v4 }
 0xa99   : > { %v1448_v9 = vadd.f32 %v1447_v8, %v1441_v4 }
 0xa9b   : > { %v1449_v10 = vmul.f32 0.7978846, %v1448_v9 }
 0xa9d   : > { %3194 = vtanh.f32 %v1449_v10 }
 0xaa7   : > { %v3195_v11 = vpop.eup %3194 }
 0xaa8   : > { %v1451_v13 = vadd.f32 1.0, %v3195_v11 }
 0xaaa   : > { %v1452_v15 = vmul.f32 %v1451_v13, %v1444_v12 }
 0xaac   : > { %2924 = vmatmul.mubr.f32.vlgmr.msra.gmra.mrb[6].mxu1 %v1452_v15 }
 0xaad   : > { %2968 = vmatprep.mubr.msk.f32.mxu1 %vm3279_vm1, %v3280_v17 }
 0xb7f   : > { %v1542_v18 = vpop.f32.mrb[6].mxu1 }
 0xb80   : > { %v1543_v19 = vadd.f32 %v2681_v16, %v1542_v18  ;;  %v2925_v20 = vpop.f32.mrb[7].mxu1 }
 0xb82   : > { %v1546_v21 = vadd.f32 %v1543_v19, %v1359_v44  ;;  %v2689_v44 = vld [vmem:[%s3918_s7 + $0x1] ss:$0 sm:$0xff] }
 0xb84   : > { %v1549_v22 = vsel %vm716_vm0, %v1546_v21, 0.0 }
 0xb85   : > { %1550 = vadd.xlane.f32.xlu0 %v1549_v22 }
 0xc12   : > { %v1551_v23 = vpop.xlane.xlu0 %1550 }
 0xc13   : > { %v1552_v24 = vmul.f32 0.03125, %v1551_v23 }
 0xc15   : > { %v1553_v25 = vsub.f32 %v1546_v21, %v1552_v24  ;;  %v2694_v21 = vld [vmem:[%s3919_s8 + $0x38] sm:$0xff] }
 0xc17   : > { %v1554_v26 = vmul.f32 %v1553_v25, %v1553_v25 }
 0xc19   : > { %v1555_v28 = vsel %vm716_vm0, %v1554_v26, 0.0 }
 0xc1a   : > { %1556 = vadd.xlane.f32.xlu0 %v1555_v28 }
 0xca7   : > { %v1557_v34 = vpop.xlane.xlu0 %1556 }
 0xca8   : > { %v1558_v36 = vmul.f32 0.03125, %v1557_v34 }
 0xcaa   : > { %v1559_v37 = vadd.f32 1e-12, %v1558_v36 }
 0xcac   : > { %3196 = vrsqrt.f32 %v1559_v37 }
 0xcb6   : > { %v3197_v38 = vpop.eup %3196 }
 0xcb7   : > { %v1561_v40 = vmul.f32 %v3197_v38, %v1553_v25 }
 0xcb9   : > { %v1568_v42 = vmul.f32 %v2682_v39, %v1561_v40 }
 0xcbb   : > { %v3671_v43 = vadd.f32 %v2683_v41, %v1568_v42  ;;  %v2709_v41 = vld [vmem:[%s3923_s12 + $0x20] sm:$0xff]  ;;  %v2710_v42 = vld [vmem:[%s3923_s12 + $0x28] sm:$0xff] }
 0xcbd   : > { %2935 = vmatmul.mubr.msk.f32.vlgmr.msra.gmra.mrb[10].mxu0 %vm716_vm0, %v3671_v43 }
 0xcbe   : > { %2939 = vmatprep.mubr.msk.f32.mxu0 %vm3279_vm1, %v3280_v17 }
 0xd90   : > { %v1658_v45 = vpop.f32.mrb[10].mxu0 }
 0xd91   : > { %v1659_v46 = vadd.f32 %v2689_v44, %v1658_v45  ;;  %v2936_v47 = vpop.f32.mrb[11].mxu0  ;;  %v3094_v44 = vpack.c.bf16 %v2710_v42, %v2709_v41  ;;  %v2712_v45 = vld [vmem:[%s3923_s12 + $0x38] sm:$0xff]  ;;  %v2410_v42 = vld [vmem:[%s3929_s18] sm:$0xff] }
 0xd92   : > { %v2716_v47 = vld [vmem:[%s3925_s14 + $0x80] sm:$0xff] }
 0xd93   : > { %1670 = vrot.lane.b32.xlu0 %v1659_v46, %s3282_s25  ;;  %s3967_s25 = smov 64  }
 0xd97   : > { %1917 = vrot.lane.b32.xlu0 %v1659_v46, %s3283_s2  ;;  %s2740_s2 = sshll.u32 %s3423_s4, 4  ;;  %s3286_s4 = smov [#allocation2]  }
 0xd98   : > { %s3869_s24 = scalar_lea.hbm %s3969_s0, %s2740_s2  ;;  %s3218_s1 = sshll.u32 %s3286_s4, 4  ;;  %s3219_s1 = int_to_ptr.vmem [resolvable:$false] %s3218_s1 }
 0xd9b   : > { %1915 = vrot.lane.b32.xlu0 %v1659_v46, %s3284_s26  ;;  %s697_s26 = scalar_lea.vmem [#allocation2], %s696_s22 }
 0xd9c   : > { %s2581_s5 = sshll.u32 %s697_s26, 4  ;;  %s3871_s5 = int_to_ptr.vmem [resolvable:$true] %s2581_s5 }
 0xd9d   : > { %s3214_s30 = scalar_lea.vmem %s3871_s5, 16  ;;  %p3221_p0 = scmp.lt.s32.totalorder %s3871_s5, %s3219_s1 }
 0xd9e   : > { %p3215_p11 = scmp.ne.s32.totalorder %s3871_s5, %s3214_s30 }
 0xda0   : > { %p3216_p12 = pnand %p3215_p11, %p3440_p5 }
 0xda2   : > { %p3217_p13 = pneg %p3216_p12 }
 0xe05   : > { %v1671_v48 = vpop.permute.xlu0 %1670 }
 0xe06   : > { %2938 = vmatpush3.xpose.msk.msra.mxu0 %vm838_vm2, %v1671_v48  ;;  %v2717_v48 = vld [vmem:[%s3925_s14 + $0x88] sm:$0xff] }
 0xe07   : > { %2942 = vmatprep.subr.mxu0 %v3280_v17 }
 0xe09   : > { %2940 = vmatmul.mubr.msk.f32.vlgmr.msra.gmra.mrb[12].mxu0 %vm838_vm2, %v1659_v46  ;;  %v1918_v2 = vpop.permute.xlu0 %1917 }
 0xe0a   : > { %2944 = vmatprep.mubr.msk.f32.mxu0 %vm3279_vm1, %v3280_v17 }
 0xe0d   : > { %v1916_v5 = vpop.permute.xlu0 %1915 }
 0xedc   : > { %v1742_v49 = vpop.f32.mrb[12].mxu0 }
 0xedd   : > { %v1746_v50 = vmul.f32 0.25, %v1742_v49  ;;  %v2941_v51 = vpop.f32.mrb[13].mxu0  ;;  %v3100_v49 = vpack.c.bf16 %v2717_v48, %v2716_v47 }
 0xedf   : > { %v1747_v52 = vadd.f32 %v3514_v35, %v1746_v50 }
 0xee1   : > { %v1748_v53 = vsel %vm921_vm3, %v1747_v52, -inf }
 0xee2   : > { %1749 = vmax.xlane.f32.xlu1 %v1748_v53 }
 0xf6f   : > { %v1750_v54 = vpop.xlane.xlu1 %1749 }
 0xf70   : > { %v1751_v55 = vsub.f32 %v1747_v52, %v1750_v54  ;;  %v2707_v54 = vld [vmem:[%s3921_s10 + $0x1] ss:$0 sm:$0xff] }
 0xf72   : > { %v1752_v56 = vmul.f32 1.442695, %v1751_v55 }
 0xf74   : > { %3198 = vpow2.f32 %v1752_v56  ;;  %v2708_v56 = vld [vmem:[%s3922_s11 + $0x1] ss:$0 sm:$0xff] }
 0xf7e   : > { %v3199_v57 = vpop.eup %3198 }
 0xf7f   : > { %v1754_v58 = vsel %vm921_vm3, %v3199_v57, 0.0 }
 0xf80   : > { %1755 = vadd.xlane.f32.xlu1 %v1754_v58 }
 0xf91   : > { %1759 = vrot.lane.b32.xlu1 %v1659_v46, %s3967_s25  ;;  %s3220_s25 = scalar_lea.vmem %s3219_s1, 32 }
 0xf92   : > { %p3222_p1 = scmp.lt.s32.totalorder %s3220_s25, %s3214_s30 }
 0xf94   : > { %p3223_p2 = por %p3222_p1, %p3221_p0 }
 0xf96   : > { %p3224_p3 = pnand %p3223_p2, %p3217_p13 }
0x100d   : > { %v1756_v59 = vpop.xlane.xlu1 %1755 }
0x100e   : > { %3200 = vrcp.f32 %v1756_v59  ;;  %v2718_v59 = vld [vmem:[%s3925_s14 + $0x90] sm:$0xff] }
0x1011   : > { %v1760_v60 = vpop.permute.xlu1 %1759 }
0x1012   : > { %2943 = vmatpush3.msra.mxu0 %v1760_v60  ;;  %v2719_v60 = vld [vmem:[%s3925_s14 + $0x98] sm:$0xff] }
0x1013   : > { %3087 = vmatprep.subr.bf16.mxu0 %v3278_v14  ;;  %v3103_v61 = vpack.c.bf16 %v2719_v60, %v2718_v59  ;;  %v2491_v59 = vld [vmem:[%s3931_s20 + $0x10] sm:$0xff] }
0x1018   : > { %v3201_v63 = vpop.eup %3200 }
0x1019   : > { %v1758_v1 = vmul.f32 %v3201_v63, %v3199_v57  ;;  %v2721_v63 = vld [vmem:[%s3925_s14 + $0xa8] sm:$0xff] }
0x101b   : > { %2945 = vmatmul.mubr.msk.f32.vlgmr.msra.gmra.mrb[14].mxu0 %vm921_vm3, %v1758_v1  ;;  %v2722_v1 = vld [vmem:[%s3925_s14 + $0xb0] sm:$0xff] }
0x101c   : > { %3089 = vmatpush3.bf16.msra.mxu0 %v3088_v0  ;;  %2951 = vmatprep.mubr.msk.f32.mxu0 %vm3279_vm1, %v3280_v17  ;;  %v3106_v0 = vpack.c.bf16 %v2721_v63, %v2720_v62  ;;  %v2414_v62 = vld [vmem:[%s3930_s19] sm:$0x1] }
0x101d   : > { %2954 = vmatprep.subr.mxu0 %v3280_v17 }
0x10ee   : > { %v1831_v3 = vpop.f32.mrb[14].mxu0 }
0x10ef   : > { %v2946_v4 = vpop.f32.mrb[15].mxu0  ;;  %2952 = vmatmul.mubr.msk.f32.vlgmr.msra.gmra.mrb[16].mxu0 %vm838_vm2, %v1831_v3 }
0x10f0   : > { %2955 = vmatpush3.xpose.msk.msra.mxu0 %vm838_vm2, %v1918_v2  ;;  %2956 = vmatprep.mubr.msk.f32.mxu0 %vm3279_vm1, %v3280_v17  ;;  %v2723_v2 = vld [vmem:[%s3925_s14 + $0xb8] sm:$0xff]  ;;  %v2724_v4 = vld [vmem:[%s3925_s14 + $0xc0] sm:$0xff] }
0x10f1   : > { %2959 = vmatprep.subr.mxu0 %v3280_v17  ;;  %v3109_v3 = vpack.c.bf16 %v2723_v2, %v2722_v1 }
0x10f3   : > { %2957 = vmatmul.mubr.msk.f32.vlgmr.msra.gmra.mrb[18].mxu0 %vm838_vm2, %v1916_v5  ;;  %v2725_v5 = vld [vmem:[%s3925_s14 + $0xc8] sm:$0xff] }
0x10f4   : > { %2961 = vmatprep.mubr.msk.f32.mxu0 %vm3279_vm1, %v3280_v17 }
0x11c2   : > { %v1904_v6 = vpop.f32.mrb[16].mxu0 }
0x11c3   : > { %v2953_v7 = vpop.f32.mrb[17].mxu0  ;;  %v1914_v27 = vadd.f32 %v2700_v29, %v1904_v6  ;;  %v3112_v6 = vpack.c.bf16 %v2725_v5, %v2724_v4 }
0x11c4   : > { %v2726_v7 = vld [vmem:[%s3925_s14 + $0xd0] sm:$0xff] }
0x11c6   : > { %v1989_v8 = vpop.f32.mrb[18].mxu0 }
0x11c7   : > { %v1993_v9 = vmul.f32 0.25, %v1989_v8  ;;  %v2958_v10 = vpop.f32.mrb[19].mxu0  ;;  %v2727_v8 = vld [vmem:[%s3925_s14 + $0xd8] sm:$0xff] }
0x11c8   : > { %v2728_v10 = vld [vmem:[%s3925_s14 + $0xe0] sm:$0xff] }
0x11c9   : > { %v1994_v11 = vadd.f32 %v3514_v35, %v1993_v9  ;;  %v2693_v35 = vld [vmem:[%s3919_s8 + $0x30] sm:$0xff]  ;;  %v3115_v9 = vpack.c.bf16 %v2727_v8, %v2726_v7 }
0x11ca   : > { %v3091_v22 = vpack.c.bf16 %v2694_v21, %v2693_v35 }
0x11cb   : > { %v1995_v12 = vsel %vm921_vm3, %v1994_v11, -inf }
0x11cc   : > { %1996 = vmax.xlane.f32.xlu0 %v1995_v12  ;;  %3092 = vmatpush3.bf16.msra.mxu1 %v3091_v22 }
0x11cd   : > { %3099 = vmatprep.subr.bf16.mxu1 %v3278_v14 }
0x11e2   : > { %2006 = vrot.lane.b32.xlu0 %v1659_v46, %s3968_s29 }
0x1259   : > { %v1997_v13 = vpop.xlane.xlu0 %1996 }
0x125a   : > { %v1998_v15 = vsub.f32 %v1994_v11, %v1997_v13  ;;  %v2729_v11 = vld [vmem:[%s3925_s14 + $0xe8] sm:$0xff]  ;;  %v2730_v13 = vld [vmem:[%s3925_s14 + $0xf0] sm:$0xff] }
0x125b   : > { %v3118_v12 = vpack.c.bf16 %v2729_v11, %v2728_v10 }
0x125c   : > { %v1999_v16 = vmul.f32 1.442695, %v1998_v15  ;;  %v2731_v15 = vld [vmem:[%s3925_s14 + $0xf8] sm:$0xff] }
0x125d   : > { %v2007_v18 = vpop.permute.xlu0 %2006 }
0x125e   : > { %3202 = vpow2.f32 %v1999_v16  ;;  %2960 = vmatpush3.msra.mxu0 %v2007_v18  ;;  %v3121_v16 = vpack.c.bf16 %v2731_v15, %v2730_v13  ;;  %v2714_v18 = vld [vmem:[%s3924_s13 + $0x1] ss:$0 sm:$0xff] }
0x125f   : > { %3093 = vmatprep.subr.bf16.mxu0 %v3278_v14 }
0x1268   : > { %v3203_v19 = vpop.eup %3202 }
0x1269   : > { %v2001_v20 = vsel %vm921_vm3, %v3203_v19, 0.0 }
0x126a   : > { %2002 = vadd.xlane.f32.xlu1 %v2001_v20 }
0x12f7   : > { %v2003_v23 = vpop.xlane.xlu1 %2002 }
0x12f8   : > { %3204 = vrcp.f32 %v2003_v23 }
0x1302   : > { %v3205_v24 = vpop.eup %3204 }
0x1303   : > { %v2005_v25 = vmul.f32 %v3205_v24, %v3203_v19 }
0x1305   : > { %2962 = vmatmul.mubr.msk.f32.vlgmr.msra.gmra.mrb[20].mxu0 %vm921_vm3, %v2005_v25 }
0x1306   : > { %2979 = vmatprep.mubr.msk.f32.mxu0 %vm3279_vm1, %v3280_v17  ;;  %3095 = vmatpush3.bf16.msra.mxu0 %v3094_v44  ;;  %v2411_v44 = vld [vmem:[%s3929_s18 + $0x8] sm:$0xff] }
0x1307   : > { %3096 = vmatprep.subr.bf16.mxu0 %v3278_v14 }
0x13d8   : > { %v2078_v26 = vpop.f32.mrb[20].mxu0 }
0x13d9   : > { %v2963_v28 = vpop.f32.mrb[21].mxu0  ;;  %2969 = vmatmul.mubr.msk.f32.vlgmr.msra.gmra.mrb[8].mxu1 %vm838_vm2, %v2078_v26 }
0x13da   : > { %3014 = vmatprep.mubr.msk.f32.mxu1 %vm3279_vm1, %v3280_v17  ;;  %3101 = vmatpush3.bf16.msra.mxu1 %v3100_v49 }
0x13db   : > { %3102 = vmatprep.subr.bf16.mxu1 %v3278_v14 }
0x13de   : > { %3104 = vmatpush3.bf16.msra.mxu1 %v3103_v61  ;;  %v2492_v61 = vld [vmem:[%s3931_s20 + $0x18] sm:$0xff] }
0x13df   : > { %3105 = vmatprep.subr.bf16.mxu1 %v3278_v14 }
0x13e2   : > { %3107 = vmatpush3.bf16.msra.mxu1 %v3106_v0 }
0x13e3   : > { %3108 = vmatprep.subr.bf16.mxu1 %v3278_v14 }
0x13e6   : > { %3110 = vmatpush3.bf16.msra.mxu1 %v3109_v3  ;;  %v2493_v3 = vld [vmem:[%s3932_s21] sm:$0x1] }
0x13e7   : > { %3111 = vmatprep.subr.bf16.mxu1 %v3278_v14 }
0x13ea   : > { %3113 = vmatpush3.bf16.msra.mxu1 %v3112_v6 }
0x13eb   : > { %3114 = vmatprep.subr.bf16.mxu1 %v3278_v14 }
0x13ee   : > { %3116 = vmatpush3.bf16.msra.mxu1 %v3115_v9 }
0x13ef   : > { %3117 = vmatprep.subr.bf16.mxu1 %v3278_v14 }
0x13f2   : > { %3119 = vmatpush3.bf16.msra.mxu1 %v3118_v12 }
0x13f3   : > { %3120 = vmatprep.subr.bf16.mxu1 %v3278_v14 }
0x13f6   : > { %3122 = vmatpush3.bf16.msra.mxu1 %v3121_v16 }
0x14ac   : > { %v2151_v30 = vpop.f32.mrb[8].mxu1 }
0x14ad   : > { %v2155_v31 = vadd.f32 %v2151_v30, %v1914_v27  ;;  %v2970_v32 = vpop.f32.mrb[9].mxu1  ;;  %v2733_v30 = vld [vmem:[%s3926_s15 + $0x1] ss:$0 sm:$0xff] }
0x14af   : > { %v2156_v33 = vadd.f32 %v2155_v31, %v3671_v43  ;;  %v2711_v43 = vld [vmem:[%s3923_s12 + $0x30] sm:$0xff] }
0x14b0   : > { %v3097_v46 = vpack.c.bf16 %v2712_v45, %v2711_v43  ;;  %v3124_v43 = vpack.c.bf16 %v2411_v44, %v2410_v42  ;;  %v2412_v45 = vld [vmem:[%s3929_s18 + $0x10] sm:$0xff] }
0x14b1   : > { %v2161_v34 = vsel %vm716_vm0, %v2156_v33, 0.0 }
0x14b2   : > { %2162 = vadd.xlane.f32.xlu1 %v2161_v34  ;;  %3098 = vmatpush3.bf16.msra.mxu0 %v3097_v46  ;;  %v2413_v46 = vld [vmem:[%s3929_s18 + $0x18] sm:$0xff] }
0x14b3   : > { %3123 = vmatprep.subr.bf16.mxu0 %v3278_v14  ;;  %v3127_v47 = vpack.c.bf16 %v2413_v46, %v2412_v45 }
0x153f   : > { %v2163_v36 = vpop.xlane.xlu1 %2162 }
0x1540   : > { %v2164_v37 = vmul.f32 0.03125, %v2163_v36 }
0x1542   : > { %v2165_v38 = vsub.f32 %v2156_v33, %v2164_v37 }
0x1544   : > { %v2166_v39 = vmul.f32 %v2165_v38, %v2165_v38 }
0x1546   : > { %v2167_v40 = vsel %vm716_vm0, %v2166_v39, 0.0 }
0x1547   : > { %2168 = vadd.xlane.f32.xlu1 %v2167_v40 }
0x15d4   : > { %v2169_v50 = vpop.xlane.xlu1 %2168 }
0x15d5   : > { %v2170_v51 = vmul.f32 0.03125, %v2169_v50 }
0x15d7   : > { %v2171_v52 = vadd.f32 1e-12, %v2170_v51 }
0x15d9   : > { %3206 = vrsqrt.f32 %v2171_v52  ;;  %v2736_v52 = vld [vmem:[%s3927_s16 + $0x1] ss:$0 sm:$0xff] }
0x15e3   : > { %v3207_v53 = vpop.eup %3206 }
0x15e4   : > { %v2173_v55 = vmul.f32 %v3207_v53, %v2165_v38 }
0x15e6   : > { %v2180_v57 = vmul.f32 %v2707_v54, %v2173_v55  ;;  %v2737_v54 = vld [vmem:[%s3928_s17 + $0x1] ss:$0 sm:$0xff] }
0x15e8   : > { %v2187_v58 = vadd.f32 %v2708_v56, %v2180_v57  ;;  %v2489_v57 = vld [vmem:[%s3931_s20] sm:$0xff] }
0x15ea   : > { %2980 = vmatmul.mubr.msk.f32.vlgmr.msra.gmra.mrb[22].mxu0 %vm716_vm0, %v2187_v58 }
0x15eb   : > { %3025 = vmatprep.mubr.msk.f32.mxu0 %vm3279_vm1, %v3280_v17  ;;  %3125 = vmatpush3.bf16.msra.mxu0 %v3124_v43 }
0x15ec   : > { %3126 = vmatprep.subr.bf16.mxu0 %v3278_v14 }
0x15ef   : > { %3128 = vmatpush3.bf16.msra.mxu0 %v3127_v47 }
0x15f0   : > { %3129 = vmatprep.subr.bf16.mxu0 %v3278_v14 }
0x16bd   : > { %v2270_v19 = vpop.f32.mrb[22].mxu0 }
0x16be   : > { %v2271_v20 = vadd.f32 %v2714_v18, %v2270_v19  ;;  %v2981_v35 = vpop.f32.mrb[23].mxu0 }
0x16c0   : > { %v2275_v21 = vmul.f32 0.044715, %v2271_v20  ;;  %v2274_v28 = vmul.f32 0.5, %v2271_v20 }
0x16c2   : > { %v2276_v22 = vmul.f32 %v2275_v21, %v2271_v20 }
0x16c4   : > { %v2277_v23 = vmul.f32 %v2276_v22, %v2271_v20 }
0x16c6   : > { %v2278_v24 = vadd.f32 %v2277_v23, %v2271_v20 }
0x16c8   : > { %v2279_v25 = vmul.f32 0.7978846, %v2278_v24 }
0x16ca   : > { %3208 = vtanh.f32 %v2279_v25 }
0x16d4   : > { %v3209_v26 = vpop.eup %3208 }
0x16d5   : > { %v2281_v29 = vadd.f32 1.0, %v3209_v26 }
0x16d7   : > { %v2282_v27 = vmul.f32 %v2281_v29, %v2274_v28 }
0x16d9   : > { %3015 = vmatmul.mubr.f32.vlgmr.msra.gmra.mrb[10].mxu1 %v2282_v27 }
0x17ac   : > { %v2374_v31 = vpop.f32.mrb[10].mxu1 }
0x17ad   : > { %v2375_v32 = vadd.f32 %v2733_v30, %v2374_v31  ;;  %v3016_v33 = vpop.f32.mrb[11].mxu1 }
0x17af   : > { %v2378_v34 = vadd.f32 %v2375_v32, %v2187_v58  ;;  %v2490_v58 = vld [vmem:[%s3931_s20 + $0x8] sm:$0xff] }
0x17b0   : > { %v3130_v60 = vpack.c.bf16 %v2490_v58, %v2489_v57 }
0x17b1   : > { %v2383_v36 = vsel %vm716_vm0, %v2378_v34, 0.0 }
0x17b2   : > { %2384 = vadd.xlane.f32.xlu1 %v2383_v36 }
0x183f   : > { %v2385_v37 = vpop.xlane.xlu1 %2384 }
0x1840   : > { %v2386_v38 = vmul.f32 0.03125, %v2385_v37 }
0x1842   : > { %v2387_v39 = vsub.f32 %v2378_v34, %v2386_v38 }
0x1844   : > { %v2388_v40 = vmul.f32 %v2387_v39, %v2387_v39 }
0x1846   : > { %v2389_v41 = vsel %vm716_vm0, %v2388_v40, 0.0 }
0x1847   : > { %2390 = vadd.xlane.f32.xlu0 %v2389_v41 }
0x18d4   : > { %v2391_v48 = vpop.xlane.xlu0 %2390 }
0x18d5   : > { %v2392_v49 = vmul.f32 0.03125, %v2391_v48 }
0x18d7   : > { %v2393_v50 = vadd.f32 1e-12, %v2392_v49 }
0x18d9   : > { %3210 = vrsqrt.f32 %v2393_v50 }
0x18e3   : > { %v3211_v51 = vpop.eup %3210 }
0x18e4   : > { %v2395_v53 = vmul.f32 %v3211_v51, %v2387_v39 }
0x18e6   : > { %v2402_v55 = vmul.f32 %v2736_v52, %v2395_v53 }
0x18e8   : > { %v2409_v56 = vadd.f32 %v2737_v54, %v2402_v55 }
0x18ea   : > { %3026 = vmatmul.mubr.msk.f32.vlgmr.msra.gmra.mrb[24].mxu0 %vm716_vm0, %v2409_v56 }
0x18eb   : > { %3036 = vmatprep.mubr.msk.f32.mxu0 %vm3279_vm1, %v3280_v17  ;;  %3131 = vmatpush3.bf16.msra.mxu0 %v3130_v60  ;;  %v3133_v17 = vpack.c.bf16 %v2492_v61, %v2491_v59 }
0x18ec   : > { %3132 = vmatprep.subr.bf16.mxu0 %v3278_v14 }
0x18ef   : > { %3134 = vmatpush3.bf16.msra.mxu0 %v3133_v17 }
0x19bd   : > { %v2484_v63 = vpop.f32.mrb[24].mxu0 }
0x19be   : > { %v2485_v0 = vadd.f32 %v2484_v63, %v2414_v62  ;;  %v3027_v1 = vpop.f32.mrb[25].mxu0 }
0x19c0   : > { %3212 = vtanh.f32 %v2485_v0 }
0x19ca   : > { %v3213_v2 = vpop.eup %3212 }
0x19cb   : > { %3037 = vmatmul.mubr.msk.f32.vlgmr.msra.gmra.mrb[26].mxu0 %vm716_vm0, %v3213_v2 }
0x1a9e   : > { %v2563_v14 = vpop.f32.mrb[26].mxu0 }
0x1a9f   : > { %v2564_v4 = vadd.f32 %v2563_v14, %v2493_v3  ;;  %v3038_v5 = vpop.f32.mrb[27].mxu0 }
0x1aa1   : > { %2567 = vst [vmem:[%s697_s26] sm:$0x1] %v2564_v4 }
0x1aa2   : > { %3227 = shalt.err (!%p3224_p3)
}
0x1aa3   : > { %s3228_s22 = scalar_lea.hbm %s3869_s24, 16  ;;  %s3232_s23 = scalar_lea.hbm %s3969_s0, 32 }
0x1aa4   : > { %p3229_p4 = scmp.ne.s32.totalorder %s3869_s24, %s3228_s22  ;;  %p3233_p9 = scmp.lt.u32.totalorder %s3869_s24, %s3969_s0 }
0x1aa5   : > { %p3234_p10 = scmp.lt.u32.totalorder %s3232_s23, %s3228_s22  ;;  %p3236_p12 = scmp.lt.u32.totalorder %s3228_s22, %s3869_s24 }
0x1aa6   : > { %p3230_p7 = pnand %p3229_p4, %p3440_p5 }
0x1aa7   : > { %p3235_p11 = por %p3234_p10, %p3233_p9 }
0x1aa8   : > { %p3231_p8 = pneg %p3230_p7 }
0x1aa9   : > { %p3237_p13 = por %p3236_p12, %p3235_p11 }
0x1aab   : > { %p3238_p0 = pnand %p3237_p13, %p3231_p8 }
0x1aad   : > { %3241 = shalt.err (!%p3238_p0)
}
0x1aae   : > { %3135 = dma.vmem_to_hbm [thread:$0]  (%p3440_p5), %s3871_s5, 16, %s3869_s24, %s2569_s3  }
0x1aaf PF: > { %s3970_s30 = sld [smem:[#allocation7_spill]]  ;;  %s3971_s1 = sld [smem:[#allocation5_spill]] }
0x1ab5   : > { %p3141_p1 = scmp.ge.s32.totalorder %s3970_s30, 2  ;;  %s2593_s2 = sand.u32 1, %s3971_s1  }
0x1ab6   : > { %s2594_s26 = scalar_lea.sflag [#allocation3], %s2593_s2 }
0x1ab7   : > { %p3138_p2 = pnand %p3141_p1, %p3444_p6 }
0x1ab9   : > { %3259 = dma.done.wait (!%p3138_p2), %s2594_s26, 16  }
0x1aba   : > { %3261 = vsyncadd (!%p3138_p2), %s2594_s26, 4294967280  ;;  %s3973_s30 = sld [smem:[#allocation8_spill]]  ;;  %s3974_s22 = sld [smem:[#allocation6_spill]] }
0x1abb   : > { %s3975_s29 = sld [smem:[#allocation9_spill]]  ;;  %s3976_s3 = smov %s3268_s28 }
0x1ac0   : > { %p32_p3 = scmp.ge.s32.totalorder %s3973_s30, 4   ;;  %s3977_s28 = smov %s3974_s22 }
0x1ac2   :  { %34 = sbr.rel (!%p32_p3) target bundleno = 12 (0xc), region = 161 }
0x1ac9   :  { %2598 = vsyncpa [#allocation3], 1 }
0x1aca   :  { %2600 = vsyncpa [#allocation3 + $0x1], 1 }

</bundles_post_ra>
